<compile_context>
chip_gen: v7x
topology: tpu7x:2x2x1
jax: 0.10.0
libtpu: 0.0.40
codegen_flags: <defaults>
</compile_context>

<pallas_src>
import functools

import jax
import jax.numpy as jnp
from jax.experimental import pallas as pl
from jax.experimental.pallas import tpu as pltpu


def _layernorm(x, gamma, beta, eps):
    mu = jnp.mean(x, axis=-1, keepdims=True)
    xc = x - mu
    var = jnp.mean(xc * xc, axis=-1, keepdims=True)
    return xc * jax.lax.rsqrt(var + eps) * gamma + beta


def _gelu_tanh(x):
    # TODO(synk): PyTorch nn.GELU() defaults to the exact erf formulation; erf
    # has no guaranteed Mosaic lowering, so the tanh approximation is used both
    # here and in the reference (max abs deviation ~1e-3).
    c = 0.7978845608028654  # sqrt(2/pi)
    return 0.5 * x * (1.0 + jnp.tanh(c * (x + 0.044715 * x * x * x)))


def encoder_kernel(x_ref, g1_ref, be1_ref, wqkv_ref, bqkv_ref, wo_ref, bo_ref,
                   g2_ref, be2_ref, w1_ref, b1_ref, w2_ref, b2_ref,
                   y_ref, att_ref, qkv_ref, ctx_ref, *, n_heads, eps, q_tile):
    # x_ref: (S, E) full sequence of the current batch element (batch squeezed)
    S, E = x_ref.shape
    Dh = E // n_heads
    scale = 1.0 / float(Dh) ** 0.5
    t = pl.program_id(1)

    # --- q-tile 0 of each batch element: LN1 + fused QKV for the WHOLE
    #     sequence, stored in bf16 VMEM scratch and reused by later q-tiles ---
    @pl.when(t == 0)
    def _():
        x_full = x_ref[...].astype(jnp.float32)
        xn = _layernorm(x_full, g1_ref[...], be1_ref[...], eps)
        qkv = jnp.dot(xn.astype(jnp.bfloat16), wqkv_ref[...],
                      preferred_element_type=jnp.float32) + bqkv_ref[...]
        qkv_ref[...] = qkv.astype(qkv_ref.dtype)

    row0 = pl.multiple_of(t * q_tile, q_tile)
    x_rows = x_ref[pl.ds(row0, q_tile), :].astype(jnp.float32)   # (TQ, E)
    q_rows = qkv_ref[pl.ds(row0, q_tile), :]                     # (TQ, 3E) bf16
    qkv_all = qkv_ref[...]                                       # (S, 3E)  bf16

    # --- multi-head attention for this q-tile --------------------------------
    # Static unroll over heads; each head's output is slice-stored into the
    # (TQ, E) ctx scratch (no concatenate, no long live ranges).  For large
    # head counts a batched contraction / head grid axis would be preferable.
    for h in range(n_heads):
        lo = h * Dh
        qh = q_rows[:, lo:lo + Dh]                    # (TQ, Dh) bf16
        kh = qkv_all[:, E + lo:E + lo + Dh]           # (S,  Dh) bf16
        vh = qkv_all[:, 2 * E + lo:2 * E + lo + Dh]   # (S,  Dh) bf16
        s = jax.lax.dot_general(qh, kh, (((1,), (1,)), ((), ())),
                                preferred_element_type=jnp.float32) * scale
        s = s - jnp.max(s, axis=-1, keepdims=True)
        e = jnp.exp(s)
        p = e * pl.reciprocal(jnp.sum(e, axis=-1, keepdims=True), approx=True)
        att_ref[h, :, :] = p.astype(att_ref.dtype)
        ctx_ref[:, lo:lo + Dh] = jnp.dot(p.astype(jnp.bfloat16), vh,
                                         preferred_element_type=jnp.float32)

    # --- output projection + residual 1 (dropout p=0.0 -> identity) ----------
    attn_out = jnp.dot(ctx_ref[...].astype(jnp.bfloat16), wo_ref[...],
                       preferred_element_type=jnp.float32) + bo_ref[...]
    x1 = x_rows + attn_out

    # --- LayerNorm 2 + MLP + residual 2 ---------------------------------------
    xn2 = _layernorm(x1, g2_ref[...], be2_ref[...], eps)
    h1 = jnp.dot(xn2.astype(jnp.bfloat16), w1_ref[...],
                 preferred_element_type=jnp.float32) + b1_ref[...]
    h1 = _gelu_tanh(h1)
    h2 = jnp.dot(h1.astype(jnp.bfloat16), w2_ref[...],
                 preferred_element_type=jnp.float32) + b2_ref[...]
    y_ref[...] = (x1 + h2).astype(y_ref.dtype)


def _build_call(*, B, S, E, HID, n_heads, q_tile, x_dtype, att_dtype, eps,
                single_buffer_params):
    T = S // q_tile
    pkw = {"pipeline_mode": pl.Buffered(1)} if single_buffer_params else {}

    def cspec(shape):  # constant (grid-invariant) parameter block
        return pl.BlockSpec(shape, lambda b, t: (0, 0), **pkw)

    # VMEM budget: resident bf16 weights + activation blocks (double-buffered)
    # + scratch + generous slack for intermediates, clamped to [32, 64] MiB.
    itm = lambda dt: jnp.dtype(dt).itemsize
    w_bytes = 2 * (E * 3 * E + E * E + 2 * E * HID)
    small_bytes = 4 * (3 * E + HID + 8 * E)
    x_bytes = 2 * itm(x_dtype) * S * E
    y_bytes = 2 * itm(x_dtype) * q_tile * E
    att_bytes = 2 * itm(att_dtype) * n_heads * q_tile * S
    scratch_bytes = 2 * S * 3 * E + 4 * q_tile * E
    interm_bytes = 4 * (S * 3 * E + q_tile * (2 * HID + 8 * E)
                        + 2 * n_heads * q_tile * S)
    est = int(1.3 * (w_bytes + small_bytes + x_bytes + y_bytes + att_bytes
                     + scratch_bytes + interm_bytes)) + (2 << 20)
    vmem_limit = min(max(est, 32 << 20), 64 << 20)

    kern = functools.partial(encoder_kernel, n_heads=n_heads, eps=eps,
                             q_tile=q_tile)
    return pl.pallas_call(
        kern,
        out_shape=(
            jax.ShapeDtypeStruct((B, S, E), x_dtype),
            jax.ShapeDtypeStruct((B, n_heads, S, S), att_dtype),
        ),
        grid=(B, T),
        in_specs=[
            pl.BlockSpec((None, S, E), lambda b, t: (b, 0, 0)),   # x (full seq)
            cspec((1, E)), cspec((1, E)),                         # LN1 gamma/beta
            cspec((E, 3 * E)), cspec((1, 3 * E)),                 # fused Wqkv, bqkv
            cspec((E, E)), cspec((1, E)),                         # Wo, bo
            cspec((1, E)), cspec((1, E)),                         # LN2 gamma/beta
            cspec((E, HID)), cspec((1, HID)),                     # fc1
            cspec((HID, E)), cspec((1, E)),                       # fc2
        ],
        out_specs=(
            pl.BlockSpec((None, q_tile, E), lambda b, t: (b, t, 0)),
            pl.BlockSpec((None, n_heads, q_tile, S), lambda b, t: (b, 0, t, 0)),
        ),
        scratch_shapes=[
            pltpu.VMEM((S, 3 * E), jnp.bfloat16),   # fused QKV for whole sequence
            pltpu.VMEM((q_tile, E), jnp.float32),   # per-tile attention context
        ],
        compiler_params=pltpu.CompilerParams(
            dimension_semantics=("parallel", "arbitrary"),
            vmem_limit_bytes=vmem_limit),
    )


def encoder_forward(x, params, n_heads, eps=1e-5, q_tile=None,
                    att_dtype=jnp.float32):
    """x: (B, S, E) -> (y: (B, S, E), att: (B, H, S, S)).

    att_dtype=jnp.bfloat16 halves the attention-matrix HBM writeback (useful on
    v5e) at the cost of a bf16 attention output.
    """
    B, S, E = x.shape
    assert E % n_heads == 0
    (g1, be1, wq, bq, wk, bk, wv, bv, wo, bo, g2, be2, w1, b1, w2, b2) = params
    HID = w1.shape[1]
    if q_tile is None:
        q_tile = 256 if S % 256 == 0 else S
    assert S % q_tile == 0

    bf16 = jnp.bfloat16
    row = lambda a: a.reshape(1, -1).astype(jnp.float32)
    wqkv = jnp.concatenate([wq, wk, wv], axis=1).astype(bf16)          # (E, 3E)
    bqkv = jnp.concatenate([bq, bk, bv], axis=0).reshape(1, -1).astype(jnp.float32)

    args = (x, row(g1), row(be1), wqkv, bqkv,
            wo.astype(bf16), row(bo), row(g2), row(be2),
            w1.astype(bf16), row(b1), w2.astype(bf16), row(b2))
    kwargs = dict(B=B, S=S, E=E, HID=HID, n_heads=n_heads, q_tile=q_tile,
                  x_dtype=x.dtype, att_dtype=att_dtype, eps=eps)
    try:
        return _build_call(single_buffer_params=True, **kwargs)(*args)
    except Exception:
        # Fallback for jax versions where pipeline_mode=pl.Buffered(1) on the
        # constant parameter BlockSpecs is not supported.
        return _build_call(single_buffer_params=False, **kwargs)(*args)


def encoder_reference(x, params, n_heads, eps=1e-5, matmul_dtype=None):
    """Pure-JAX reference of the PyTorch Encoder forward (tanh-GELU).

    If matmul_dtype is given (e.g. bf16), matmul operands are cast to it with
    f32 accumulation, mirroring the kernel's MXU path for tight comparison.
    """
    (g1, be1, wq, bq, wk, bk, wv, bv, wo, bo, g2, be2, w1, b1, w2, b2) = params
    B, S, E = x.shape
    Dh = E // n_heads
    cast = (lambda a: a.astype(matmul_dtype)) if matmul_dtype is not None else (lambda a: a)

    def mm(a, b):
        return jnp.einsum('...ij,jk->...ik', cast(a), cast(b),
                          preferred_element_type=jnp.float32)

    def ln(z, g, b):
        mu = jnp.mean(z, axis=-1, keepdims=True)
        var = jnp.mean((z - mu) ** 2, axis=-1, keepdims=True)
        return (z - mu) * jax.lax.rsqrt(var + eps) * g + b

    xf = x.astype(jnp.float32)
    xn = ln(xf, g1, be1)
    q = mm(xn, wq) + bq
    k = mm(xn, wk) + bk
    v = mm(xn, wv) + bv
    heads = lambda z: z.reshape(B, S, n_heads, Dh).transpose(0, 2, 1, 3)
    qh, kh, vh = heads(q), heads(k), heads(v)
    scores = jnp.einsum('bhqd,bhkd->bhqk', cast(qh), cast(kh),
                        preferred_element_type=jnp.float32) / float(Dh) ** 0.5
    att = jax.nn.softmax(scores, axis=-1)
    ctx = jnp.einsum('bhqk,bhkd->bhqd', cast(att), cast(vh),
                     preferred_element_type=jnp.float32)
    ctx = ctx.transpose(0, 2, 1, 3).reshape(B, S, E)
    x1 = xf + mm(ctx, wo) + bo
    xn2 = ln(x1, g2, be2)
    y = x1 + mm(_gelu_tanh(mm(xn2, w1) + b1), w2) + b2
    return y.astype(x.dtype), att


def init_params(key, embed_dim, forward_mul, dtype=jnp.float32):
    """nn.Linear-style uniform init; weights stored (in, out); LN = ones/zeros."""
    hid = embed_dim * forward_mul
    ks = jax.random.split(key, 12)

    def lin(kw, kb, fin, fout):
        s = 1.0 / (fin ** 0.5)
        w = jax.random.uniform(kw, (fin, fout), dtype, minval=-s, maxval=s)
        b = jax.random.uniform(kb, (fout,), dtype, minval=-s, maxval=s)
        return w, b

    wq, bq = lin(ks[0], ks[1], embed_dim, embed_dim)
    wk, bk = lin(ks[2], ks[3], embed_dim, embed_dim)
    wv, bv = lin(ks[4], ks[5], embed_dim, embed_dim)
    wo, bo = lin(ks[6], ks[7], embed_dim, embed_dim)
    w1, b1 = lin(ks[8], ks[9], embed_dim, hid)
    w2, b2 = lin(ks[10], ks[11], hid, embed_dim)
    g1 = jnp.ones((embed_dim,), dtype); be1 = jnp.zeros((embed_dim,), dtype)
    g2 = jnp.ones((embed_dim,), dtype); be2 = jnp.zeros((embed_dim,), dtype)
    return (g1, be1, wq, bq, wk, bk, wv, bv, wo, bo, g2, be2, w1, b1, w2, b2)


if __name__ == "__main__":
    B, S, E, H, FWD_MUL = 2, 8, 32, 4, 2

    key = jax.random.PRNGKey(0)
    kx, kp = jax.random.split(key)
    x = jax.random.normal(kx, (B, S, E), dtype=jnp.float32)
    params = init_params(kp, E, FWD_MUL)

    y, att = encoder_forward(x, params, n_heads=H)
    jax.block_until_ready((y, att))

    # Exact f32 module math (loose check: kernel matmuls run in bf16) and a
    # bf16-matched reference (tight check of the kernel logic).
    y_f32, att_f32 = encoder_reference(x, params, n_heads=H)
    y_b16, att_b16 = encoder_reference(x, params, n_heads=H,
                                       matmul_dtype=jnp.bfloat16)

    assert y.shape == (B, S, E)
    assert att.shape == (B, H, S, S)
    assert jnp.allclose(y, y_b16, atol=2e-2, rtol=2e-2)
    assert jnp.allclose(att, att_b16, atol=1e-2, rtol=1e-2)
    assert jnp.allclose(y, y_f32, atol=1e-1, rtol=5e-2)
    assert jnp.allclose(att, att_f32, atol=5e-2, rtol=5e-2)

    print("KERNEL_OK")
</pallas_src>

<mosaic_0001>
module attributes {stable_mosaic.version = 11 : i64} {
  func.func @encoder_kernel(%arg0: i32, %arg1: i32, %arg2: memref<1x8x32xf32, #tpu.memory_space<vmem>>, %arg3: memref<1x32xf32, #tpu.memory_space<vmem>>, %arg4: memref<1x32xf32, #tpu.memory_space<vmem>>, %arg5: memref<32x96xbf16, #tpu.memory_space<vmem>>, %arg6: memref<1x96xf32, #tpu.memory_space<vmem>>, %arg7: memref<32x32xbf16, #tpu.memory_space<vmem>>, %arg8: memref<1x32xf32, #tpu.memory_space<vmem>>, %arg9: memref<1x32xf32, #tpu.memory_space<vmem>>, %arg10: memref<1x32xf32, #tpu.memory_space<vmem>>, %arg11: memref<32x64xbf16, #tpu.memory_space<vmem>>, %arg12: memref<1x64xf32, #tpu.memory_space<vmem>>, %arg13: memref<64x32xbf16, #tpu.memory_space<vmem>>, %arg14: memref<1x32xf32, #tpu.memory_space<vmem>>, %arg15: memref<1x8x32xf32, #tpu.memory_space<vmem>>, %arg16: memref<1x4x8x8xf32, #tpu.memory_space<vmem>>, %arg17: memref<8x96xbf16, #tpu.memory_space<vmem>>, %arg18: memref<8x32xf32, #tpu.memory_space<vmem>>) attributes {dimension_semantics = [#tpu.dimension_semantics<parallel>, #tpu.dimension_semantics<arbitrary>], iteration_bounds = array<i64: 2, 1>, scalar_prefetch = 0 : i64, scratch_operands = 2 : i64, tpu.core_type = #tpu.core_type<tc>, window_params = [{transform_indices = @transform_0, window_bounds = array<i64: 1, 8, 32>}, {pipeline_mode = #tpu.pipeline_mode<synchronous>, transform_indices = @transform_1, window_bounds = array<i64: 1, 32>}, {pipeline_mode = #tpu.pipeline_mode<synchronous>, transform_indices = @transform_2, window_bounds = array<i64: 1, 32>}, {pipeline_mode = #tpu.pipeline_mode<synchronous>, transform_indices = @transform_3, window_bounds = array<i64: 32, 96>}, {pipeline_mode = #tpu.pipeline_mode<synchronous>, transform_indices = @transform_4, window_bounds = array<i64: 1, 96>}, {pipeline_mode = #tpu.pipeline_mode<synchronous>, transform_indices = @transform_5, window_bounds = array<i64: 32, 32>}, {pipeline_mode = #tpu.pipeline_mode<synchronous>, transform_indices = @transform_6, window_bounds = array<i64: 1, 32>}, {pipeline_mode = #tpu.pipeline_mode<synchronous>, transform_indices = @transform_7, window_bounds = array<i64: 1, 32>}, {pipeline_mode = #tpu.pipeline_mode<synchronous>, transform_indices = @transform_8, window_bounds = array<i64: 1, 32>}, {pipeline_mode = #tpu.pipeline_mode<synchronous>, transform_indices = @transform_9, window_bounds = array<i64: 32, 64>}, {pipeline_mode = #tpu.pipeline_mode<synchronous>, transform_indices = @transform_10, window_bounds = array<i64: 1, 64>}, {pipeline_mode = #tpu.pipeline_mode<synchronous>, transform_indices = @transform_11, window_bounds = array<i64: 64, 32>}, {pipeline_mode = #tpu.pipeline_mode<synchronous>, transform_indices = @transform_12, window_bounds = array<i64: 1, 32>}, {transform_indices = @transform_13, window_bounds = array<i64: 1, 8, 32>}, {transform_indices = @transform_14, window_bounds = array<i64: 1, 4, 8, 8>}]} {
    %c0_i32 = arith.constant 0 : i32
    %0 = arith.cmpi eq, %arg1, %c0_i32 : i32
    %1 = arith.extui %0 : i1 to i32
    %c0_i32_0 = arith.constant 0 : i32
    %2 = arith.cmpi ne, %1, %c0_i32_0 : i32
    scf.if %2 {
      %c0_75 = arith.constant 0 : index
      %c0_76 = arith.constant 0 : index
      %c0_77 = arith.constant 0 : index
      %158 = vector.load %arg2[%c0_75, %c0_76, %c0_77] : memref<1x8x32xf32, #tpu.memory_space<vmem>>, vector<1x8x32xf32>
      %159 = vector.shape_cast %158 : vector<1x8x32xf32> to vector<8x32xf32>
      %c0_78 = arith.constant 0 : index
      %c0_79 = arith.constant 0 : index
      %160 = vector.load %arg3[%c0_78, %c0_79] : memref<1x32xf32, #tpu.memory_space<vmem>>, vector<1x32xf32>
      %c0_80 = arith.constant 0 : index
      %c0_81 = arith.constant 0 : index
      %161 = vector.load %arg4[%c0_80, %c0_81] : memref<1x32xf32, #tpu.memory_space<vmem>>, vector<1x32xf32>
      %cst_82 = arith.constant dense<0.000000e+00> : vector<8xf32>
      %162 = vector.multi_reduction <add>, %159, %cst_82 [1] : vector<8x32xf32> to vector<8xf32>
      %163 = vector.shape_cast %162 : vector<8xf32> to vector<8x1xf32>
      %cst_83 = arith.constant 3.200000e+01 : f32
      %164 = vector.broadcast %cst_83 : f32 to vector<8x1xf32>
      %165 = arith.divf %163, %164 : vector<8x1xf32>
      %166 = vector.broadcast %165 : vector<8x1xf32> to vector<8x32xf32>
      %167 = arith.subf %159, %166 : vector<8x32xf32>
      %168 = arith.mulf %167, %167 : vector<8x32xf32>
      %cst_84 = arith.constant dense<0.000000e+00> : vector<8xf32>
      %169 = vector.multi_reduction <add>, %168, %cst_84 [1] : vector<8x32xf32> to vector<8xf32>
      %170 = vector.shape_cast %169 : vector<8xf32> to vector<8x1xf32>
      %cst_85 = arith.constant 3.200000e+01 : f32
      %171 = vector.broadcast %cst_85 : f32 to vector<8x1xf32>
      %172 = arith.divf %170, %171 : vector<8x1xf32>
      %cst_86 = arith.constant 9.99999974E-6 : f32
      %173 = vector.broadcast %cst_86 : f32 to vector<8x1xf32>
      %174 = arith.addf %172, %173 : vector<8x1xf32>
      %175 = math.rsqrt %174 : vector<8x1xf32>
      %176 = vector.broadcast %175 : vector<8x1xf32> to vector<8x32xf32>
      %177 = arith.mulf %167, %176 : vector<8x32xf32>
      %178 = vector.broadcast %160 : vector<1x32xf32> to vector<8x32xf32>
      %179 = arith.mulf %177, %178 : vector<8x32xf32>
      %180 = vector.broadcast %161 : vector<1x32xf32> to vector<8x32xf32>
      %181 = arith.addf %179, %180 : vector<8x32xf32>
      %182 = arith.truncf %181 : vector<8x32xf32> to vector<8x32xbf16>
      %c0_87 = arith.constant 0 : index
      %c0_88 = arith.constant 0 : index
      %183 = vector.load %arg5[%c0_87, %c0_88] : memref<32x96xbf16, #tpu.memory_space<vmem>>, vector<32x96xbf16>
      %cst_89 = arith.constant dense<0.000000e+00> : vector<8x96xf32>
      %184 = tpu.matmul %182, %183, %cst_89 {dimension_numbers = #tpu.dot_dimension_numbers<[1], [0], [0], [1], [0, 0, 1, 1], [], []>} : vector<8x32xbf16>, vector<32x96xbf16>, vector<8x96xf32> -> vector<8x96xf32>
      %c0_90 = arith.constant 0 : index
      %c0_91 = arith.constant 0 : index
      %185 = vector.load %arg6[%c0_90, %c0_91] : memref<1x96xf32, #tpu.memory_space<vmem>>, vector<1x96xf32>
      %186 = vector.broadcast %185 : vector<1x96xf32> to vector<8x96xf32>
      %187 = arith.addf %184, %186 : vector<8x96xf32>
      %188 = arith.truncf %187 : vector<8x96xf32> to vector<8x96xbf16>
      %c0_92 = arith.constant 0 : index
      %c0_93 = arith.constant 0 : index
      %189 = vector.load %arg17[%c0_92, %c0_93] : memref<8x96xbf16, #tpu.memory_space<vmem>>, vector<8x96xbf16>
      tpu.vector_store %arg17[%c0_92, %c0_93], %188 {strides = array<i32>} : memref<8x96xbf16, #tpu.memory_space<vmem>>, vector<8x96xbf16>,
    } else {
    }
    %c8_i32 = arith.constant 8 : i32
    %3 = arith.muli %arg1, %c8_i32 : i32
    %4 = tpu.assume_multiple %3, 8 : i32
    %c0 = arith.constant 0 : index
    %5 = arith.index_cast %4 : i32 to index
    %c0_1 = arith.constant 0 : index
    %6 = vector.load %arg2[%c0, %5, %c0_1] : memref<1x8x32xf32, #tpu.memory_space<vmem>>, vector<1x8x32xf32>
    %7 = vector.shape_cast %6 : vector<1x8x32xf32> to vector<8x32xf32>
    %8 = arith.index_cast %4 : i32 to index
    %c0_2 = arith.constant 0 : index
    %9 = vector.load %arg17[%8, %c0_2] : memref<8x96xbf16, #tpu.memory_space<vmem>>, vector<8x96xbf16>
    %c0_3 = arith.constant 0 : index
    %c0_4 = arith.constant 0 : index
    %10 = vector.load %arg17[%c0_3, %c0_4] : memref<8x96xbf16, #tpu.memory_space<vmem>>, vector<8x96xbf16>
    %11 = vector.extract_strided_slice %9 {offsets = [0, 0], sizes = [8, 8], strides = [1, 1]} : vector<8x96xbf16> to vector<8x8xbf16>
    %12 = vector.extract_strided_slice %10 {offsets = [0, 32], sizes = [8, 8], strides = [1, 1]} : vector<8x96xbf16> to vector<8x8xbf16>
    %13 = vector.extract_strided_slice %10 {offsets = [0, 64], sizes = [8, 8], strides = [1, 1]} : vector<8x96xbf16> to vector<8x8xbf16>
    %cst = arith.constant dense<0.000000e+00> : vector<8x8xf32>
    %14 = tpu.matmul %11, %12, %cst {dimension_numbers = #tpu.dot_dimension_numbers<[1], [1], [0], [0], [0, 0, 1, 0], [], []>} : vector<8x8xbf16>, vector<8x8xbf16>, vector<8x8xf32> -> vector<8x8xf32>
    %cst_5 = arith.constant 0.353553385 : f32
    %15 = vector.broadcast %cst_5 : f32 to vector<8x8xf32>
    %16 = arith.mulf %14, %15 : vector<8x8xf32>
    %cst_6 = arith.constant dense<0xFF800000> : vector<8xf32>
    %17 = vector.multi_reduction <maximumf>, %16, %cst_6 [1] : vector<8x8xf32> to vector<8xf32>
    %18 = vector.shape_cast %17 : vector<8xf32> to vector<8x1xf32>
    %19 = vector.broadcast %18 : vector<8x1xf32> to vector<8x8xf32>
    %20 = arith.subf %16, %19 : vector<8x8xf32>
    %21 = math.exp %20 : vector<8x8xf32>
    %cst_7 = arith.constant dense<0.000000e+00> : vector<8xf32>
    %22 = vector.multi_reduction <add>, %21, %cst_7 [1] : vector<8x8xf32> to vector<8xf32>
    %23 = vector.shape_cast %22 : vector<8xf32> to vector<8x1xf32>
    %24 = tpu.reciprocal %23 {approx = true} : vector<8x1xf32> -> vector<8x1xf32>
    %25 = vector.broadcast %24 : vector<8x1xf32> to vector<8x8xf32>
    %26 = arith.mulf %21, %25 : vector<8x8xf32>
    %c0_8 = arith.constant 0 : index
    %c0_9 = arith.constant 0 : index
    %c0_10 = arith.constant 0 : index
    %c0_11 = arith.constant 0 : index
    %27 = vector.load %arg16[%c0_8, %c0_9, %c0_10, %c0_11] : memref<1x4x8x8xf32, #tpu.memory_space<vmem>>, vector<1x1x8x8xf32>
    %28 = vector.shape_cast %27 : vector<1x1x8x8xf32> to vector<8x8xf32>
    %29 = vector.shape_cast %26 : vector<8x8xf32> to vector<1x1x8x8xf32>
    tpu.vector_store %arg16[%c0_8, %c0_9, %c0_10, %c0_11], %29 {strides = array<i32>} : memref<1x4x8x8xf32, #tpu.memory_space<vmem>>, vector<1x1x8x8xf32>,
    %30 = arith.truncf %26 : vector<8x8xf32> to vector<8x8xbf16>
    %cst_12 = arith.constant dense<0.000000e+00> : vector<8x8xf32>
    %31 = tpu.matmul %30, %13, %cst_12 {dimension_numbers = #tpu.dot_dimension_numbers<[1], [0], [0], [1], [0, 0, 1, 1], [], []>} : vector<8x8xbf16>, vector<8x8xbf16>, vector<8x8xf32> -> vector<8x8xf32>
    %c0_13 = arith.constant 0 : index
    %c0_14 = arith.constant 0 : index
    %32 = vector.load %arg18[%c0_13, %c0_14] : memref<8x32xf32, #tpu.memory_space<vmem>>, vector<8x8xf32>
    tpu.vector_store %arg18[%c0_13, %c0_14], %31 {strides = array<i32>} : memref<8x32xf32, #tpu.memory_space<vmem>>, vector<8x8xf32>,
    %33 = vector.extract_strided_slice %9 {offsets = [0, 8], sizes = [8, 8], strides = [1, 1]} : vector<8x96xbf16> to vector<8x8xbf16>
    %34 = vector.extract_strided_slice %10 {offsets = [0, 40], sizes = [8, 8], strides = [1, 1]} : vector<8x96xbf16> to vector<8x8xbf16>
    %35 = vector.extract_strided_slice %10 {offsets = [0, 72], sizes = [8, 8], strides = [1, 1]} : vector<8x96xbf16> to vector<8x8xbf16>
    %cst_15 = arith.constant dense<0.000000e+00> : vector<8x8xf32>
    %36 = tpu.matmul %33, %34, %cst_15 {dimension_numbers = #tpu.dot_dimension_numbers<[1], [1], [0], [0], [0, 0, 1, 0], [], []>} : vector<8x8xbf16>, vector<8x8xbf16>, vector<8x8xf32> -> vector<8x8xf32>
    %cst_16 = arith.constant 0.353553385 : f32
    %37 = vector.broadcast %cst_16 : f32 to vector<8x8xf32>
    %38 = arith.mulf %36, %37 : vector<8x8xf32>
    %cst_17 = arith.constant dense<0xFF800000> : vector<8xf32>
    %39 = vector.multi_reduction <maximumf>, %38, %cst_17 [1] : vector<8x8xf32> to vector<8xf32>
    %40 = vector.shape_cast %39 : vector<8xf32> to vector<8x1xf32>
    %41 = vector.broadcast %40 : vector<8x1xf32> to vector<8x8xf32>
    %42 = arith.subf %38, %41 : vector<8x8xf32>
    %43 = math.exp %42 : vector<8x8xf32>
    %cst_18 = arith.constant dense<0.000000e+00> : vector<8xf32>
    %44 = vector.multi_reduction <add>, %43, %cst_18 [1] : vector<8x8xf32> to vector<8xf32>
    %45 = vector.shape_cast %44 : vector<8xf32> to vector<8x1xf32>
    %46 = tpu.reciprocal %45 {approx = true} : vector<8x1xf32> -> vector<8x1xf32>
    %47 = vector.broadcast %46 : vector<8x1xf32> to vector<8x8xf32>
    %48 = arith.mulf %43, %47 : vector<8x8xf32>
    %c0_19 = arith.constant 0 : index
    %c1 = arith.constant 1 : index
    %c0_20 = arith.constant 0 : index
    %c0_21 = arith.constant 0 : index
    %49 = vector.load %arg16[%c0_19, %c1, %c0_20, %c0_21] : memref<1x4x8x8xf32, #tpu.memory_space<vmem>>, vector<1x1x8x8xf32>
    %50 = vector.shape_cast %49 : vector<1x1x8x8xf32> to vector<8x8xf32>
    %51 = vector.shape_cast %48 : vector<8x8xf32> to vector<1x1x8x8xf32>
    tpu.vector_store %arg16[%c0_19, %c1, %c0_20, %c0_21], %51 {strides = array<i32>} : memref<1x4x8x8xf32, #tpu.memory_space<vmem>>, vector<1x1x8x8xf32>,
    %52 = arith.truncf %48 : vector<8x8xf32> to vector<8x8xbf16>
    %cst_22 = arith.constant dense<0.000000e+00> : vector<8x8xf32>
    %53 = tpu.matmul %52, %35, %cst_22 {dimension_numbers = #tpu.dot_dimension_numbers<[1], [0], [0], [1], [0, 0, 1, 1], [], []>} : vector<8x8xbf16>, vector<8x8xbf16>, vector<8x8xf32> -> vector<8x8xf32>
    %c0_23 = arith.constant 0 : index
    %c8 = arith.constant 8 : index
    %54 = vector.load %arg18[%c0_23, %c8] : memref<8x32xf32, #tpu.memory_space<vmem>>, vector<8x8xf32>
    tpu.vector_store %arg18[%c0_23, %c8], %53 {strides = array<i32>} : memref<8x32xf32, #tpu.memory_space<vmem>>, vector<8x8xf32>,
    %55 = vector.extract_strided_slice %9 {offsets = [0, 16], sizes = [8, 8], strides = [1, 1]} : vector<8x96xbf16> to vector<8x8xbf16>
    %56 = vector.extract_strided_slice %10 {offsets = [0, 48], sizes = [8, 8], strides = [1, 1]} : vector<8x96xbf16> to vector<8x8xbf16>
    %57 = vector.extract_strided_slice %10 {offsets = [0, 80], sizes = [8, 8], strides = [1, 1]} : vector<8x96xbf16> to vector<8x8xbf16>
    %cst_24 = arith.constant dense<0.000000e+00> : vector<8x8xf32>
    %58 = tpu.matmul %55, %56, %cst_24 {dimension_numbers = #tpu.dot_dimension_numbers<[1], [1], [0], [0], [0, 0, 1, 0], [], []>} : vector<8x8xbf16>, vector<8x8xbf16>, vector<8x8xf32> -> vector<8x8xf32>
    %cst_25 = arith.constant 0.353553385 : f32
    %59 = vector.broadcast %cst_25 : f32 to vector<8x8xf32>
    %60 = arith.mulf %58, %59 : vector<8x8xf32>
    %cst_26 = arith.constant dense<0xFF800000> : vector<8xf32>
    %61 = vector.multi_reduction <maximumf>, %60, %cst_26 [1] : vector<8x8xf32> to vector<8xf32>
    %62 = vector.shape_cast %61 : vector<8xf32> to vector<8x1xf32>
    %63 = vector.broadcast %62 : vector<8x1xf32> to vector<8x8xf32>
    %64 = arith.subf %60, %63 : vector<8x8xf32>
    %65 = math.exp %64 : vector<8x8xf32>
    %cst_27 = arith.constant dense<0.000000e+00> : vector<8xf32>
    %66 = vector.multi_reduction <add>, %65, %cst_27 [1] : vector<8x8xf32> to vector<8xf32>
    %67 = vector.shape_cast %66 : vector<8xf32> to vector<8x1xf32>
    %68 = tpu.reciprocal %67 {approx = true} : vector<8x1xf32> -> vector<8x1xf32>
    %69 = vector.broadcast %68 : vector<8x1xf32> to vector<8x8xf32>
    %70 = arith.mulf %65, %69 : vector<8x8xf32>
    %c0_28 = arith.constant 0 : index
    %c2 = arith.constant 2 : index
    %c0_29 = arith.constant 0 : index
    %c0_30 = arith.constant 0 : index
    %71 = vector.load %arg16[%c0_28, %c2, %c0_29, %c0_30] : memref<1x4x8x8xf32, #tpu.memory_space<vmem>>, vector<1x1x8x8xf32>
    %72 = vector.shape_cast %71 : vector<1x1x8x8xf32> to vector<8x8xf32>
    %73 = vector.shape_cast %70 : vector<8x8xf32> to vector<1x1x8x8xf32>
    tpu.vector_store %arg16[%c0_28, %c2, %c0_29, %c0_30], %73 {strides = array<i32>} : memref<1x4x8x8xf32, #tpu.memory_space<vmem>>, vector<1x1x8x8xf32>,
    %74 = arith.truncf %70 : vector<8x8xf32> to vector<8x8xbf16>
    %cst_31 = arith.constant dense<0.000000e+00> : vector<8x8xf32>
    %75 = tpu.matmul %74, %57, %cst_31 {dimension_numbers = #tpu.dot_dimension_numbers<[1], [0], [0], [1], [0, 0, 1, 1], [], []>} : vector<8x8xbf16>, vector<8x8xbf16>, vector<8x8xf32> -> vector<8x8xf32>
    %c0_32 = arith.constant 0 : index
    %c16 = arith.constant 16 : index
    %76 = vector.load %arg18[%c0_32, %c16] : memref<8x32xf32, #tpu.memory_space<vmem>>, vector<8x8xf32>
    tpu.vector_store %arg18[%c0_32, %c16], %75 {strides = array<i32>} : memref<8x32xf32, #tpu.memory_space<vmem>>, vector<8x8xf32>,
    %77 = vector.extract_strided_slice %9 {offsets = [0, 24], sizes = [8, 8], strides = [1, 1]} : vector<8x96xbf16> to vector<8x8xbf16>
    %78 = vector.extract_strided_slice %10 {offsets = [0, 56], sizes = [8, 8], strides = [1, 1]} : vector<8x96xbf16> to vector<8x8xbf16>
    %79 = vector.extract_strided_slice %10 {offsets = [0, 88], sizes = [8, 8], strides = [1, 1]} : vector<8x96xbf16> to vector<8x8xbf16>
    %cst_33 = arith.constant dense<0.000000e+00> : vector<8x8xf32>
    %80 = tpu.matmul %77, %78, %cst_33 {dimension_numbers = #tpu.dot_dimension_numbers<[1], [1], [0], [0], [0, 0, 1, 0], [], []>} : vector<8x8xbf16>, vector<8x8xbf16>, vector<8x8xf32> -> vector<8x8xf32>
    %cst_34 = arith.constant 0.353553385 : f32
    %81 = vector.broadcast %cst_34 : f32 to vector<8x8xf32>
    %82 = arith.mulf %80, %81 : vector<8x8xf32>
    %cst_35 = arith.constant dense<0xFF800000> : vector<8xf32>
    %83 = vector.multi_reduction <maximumf>, %82, %cst_35 [1] : vector<8x8xf32> to vector<8xf32>
    %84 = vector.shape_cast %83 : vector<8xf32> to vector<8x1xf32>
    %85 = vector.broadcast %84 : vector<8x1xf32> to vector<8x8xf32>
    %86 = arith.subf %82, %85 : vector<8x8xf32>
    %87 = math.exp %86 : vector<8x8xf32>
    %cst_36 = arith.constant dense<0.000000e+00> : vector<8xf32>
    %88 = vector.multi_reduction <add>, %87, %cst_36 [1] : vector<8x8xf32> to vector<8xf32>
    %89 = vector.shape_cast %88 : vector<8xf32> to vector<8x1xf32>
    %90 = tpu.reciprocal %89 {approx = true} : vector<8x1xf32> -> vector<8x1xf32>
    %91 = vector.broadcast %90 : vector<8x1xf32> to vector<8x8xf32>
    %92 = arith.mulf %87, %91 : vector<8x8xf32>
    %c0_37 = arith.constant 0 : index
    %c3 = arith.constant 3 : index
    %c0_38 = arith.constant 0 : index
    %c0_39 = arith.constant 0 : index
    %93 = vector.load %arg16[%c0_37, %c3, %c0_38, %c0_39] : memref<1x4x8x8xf32, #tpu.memory_space<vmem>>, vector<1x1x8x8xf32>
    %94 = vector.shape_cast %93 : vector<1x1x8x8xf32> to vector<8x8xf32>
    %95 = vector.shape_cast %92 : vector<8x8xf32> to vector<1x1x8x8xf32>
    tpu.vector_store %arg16[%c0_37, %c3, %c0_38, %c0_39], %95 {strides = array<i32>} : memref<1x4x8x8xf32, #tpu.memory_space<vmem>>, vector<1x1x8x8xf32>,
    %96 = arith.truncf %92 : vector<8x8xf32> to vector<8x8xbf16>
    %cst_40 = arith.constant dense<0.000000e+00> : vector<8x8xf32>
    %97 = tpu.matmul %96, %79, %cst_40 {dimension_numbers = #tpu.dot_dimension_numbers<[1], [0], [0], [1], [0, 0, 1, 1], [], []>} : vector<8x8xbf16>, vector<8x8xbf16>, vector<8x8xf32> -> vector<8x8xf32>
    %c0_41 = arith.constant 0 : index
    %c24 = arith.constant 24 : index
    %98 = vector.load %arg18[%c0_41, %c24] : memref<8x32xf32, #tpu.memory_space<vmem>>, vector<8x8xf32>
    tpu.vector_store %arg18[%c0_41, %c24], %97 {strides = array<i32>} : memref<8x32xf32, #tpu.memory_space<vmem>>, vector<8x8xf32>,
    %c0_42 = arith.constant 0 : index
    %c0_43 = arith.constant 0 : index
    %99 = vector.load %arg18[%c0_42, %c0_43] : memref<8x32xf32, #tpu.memory_space<vmem>>, vector<8x32xf32>
    %100 = arith.truncf %99 : vector<8x32xf32> to vector<8x32xbf16>
    %c0_44 = arith.constant 0 : index
    %c0_45 = arith.constant 0 : index
    %101 = vector.load %arg7[%c0_44, %c0_45] : memref<32x32xbf16, #tpu.memory_space<vmem>>, vector<32x32xbf16>
    %cst_46 = arith.constant dense<0.000000e+00> : vector<8x32xf32>
    %102 = tpu.matmul %100, %101, %cst_46 {dimension_numbers = #tpu.dot_dimension_numbers<[1], [0], [0], [1], [0, 0, 1, 1], [], []>} : vector<8x32xbf16>, vector<32x32xbf16>, vector<8x32xf32> -> vector<8x32xf32>
    %c0_47 = arith.constant 0 : index
    %c0_48 = arith.constant 0 : index
    %103 = vector.load %arg8[%c0_47, %c0_48] : memref<1x32xf32, #tpu.memory_space<vmem>>, vector<1x32xf32>
    %104 = vector.broadcast %103 : vector<1x32xf32> to vector<8x32xf32>
    %105 = arith.addf %102, %104 : vector<8x32xf32>
    %106 = arith.addf %7, %105 : vector<8x32xf32>
    %c0_49 = arith.constant 0 : index
    %c0_50 = arith.constant 0 : index
    %107 = vector.load %arg9[%c0_49, %c0_50] : memref<1x32xf32, #tpu.memory_space<vmem>>, vector<1x32xf32>
    %c0_51 = arith.constant 0 : index
    %c0_52 = arith.constant 0 : index
    %108 = vector.load %arg10[%c0_51, %c0_52] : memref<1x32xf32, #tpu.memory_space<vmem>>, vector<1x32xf32>
    %cst_53 = arith.constant dense<0.000000e+00> : vector<8xf32>
    %109 = vector.multi_reduction <add>, %106, %cst_53 [1] : vector<8x32xf32> to vector<8xf32>
    %110 = vector.shape_cast %109 : vector<8xf32> to vector<8x1xf32>
    %cst_54 = arith.constant 3.200000e+01 : f32
    %111 = vector.broadcast %cst_54 : f32 to vector<8x1xf32>
    %112 = arith.divf %110, %111 : vector<8x1xf32>
    %113 = vector.broadcast %112 : vector<8x1xf32> to vector<8x32xf32>
    %114 = arith.subf %106, %113 : vector<8x32xf32>
    %115 = arith.mulf %114, %114 : vector<8x32xf32>
    %cst_55 = arith.constant dense<0.000000e+00> : vector<8xf32>
    %116 = vector.multi_reduction <add>, %115, %cst_55 [1] : vector<8x32xf32> to vector<8xf32>
    %117 = vector.shape_cast %116 : vector<8xf32> to vector<8x1xf32>
    %cst_56 = arith.constant 3.200000e+01 : f32
    %118 = vector.broadcast %cst_56 : f32 to vector<8x1xf32>
    %119 = arith.divf %117, %118 : vector<8x1xf32>
    %cst_57 = arith.constant 9.99999974E-6 : f32
    %120 = vector.broadcast %cst_57 : f32 to vector<8x1xf32>
    %121 = arith.addf %119, %120 : vector<8x1xf32>
    %122 = math.rsqrt %121 : vector<8x1xf32>
    %123 = vector.broadcast %122 : vector<8x1xf32> to vector<8x32xf32>
    %124 = arith.mulf %114, %123 : vector<8x32xf32>
    %125 = vector.broadcast %107 : vector<1x32xf32> to vector<8x32xf32>
    %126 = arith.mulf %124, %125 : vector<8x32xf32>
    %127 = vector.broadcast %108 : vector<1x32xf32> to vector<8x32xf32>
    %128 = arith.addf %126, %127 : vector<8x32xf32>
    %129 = arith.truncf %128 : vector<8x32xf32> to vector<8x32xbf16>
    %c0_58 = arith.constant 0 : index
    %c0_59 = arith.constant 0 : index
    %130 = vector.load %arg11[%c0_58, %c0_59] : memref<32x64xbf16, #tpu.memory_space<vmem>>, vector<32x64xbf16>
    %cst_60 = arith.constant dense<0.000000e+00> : vector<8x64xf32>
    %131 = tpu.matmul %129, %130, %cst_60 {dimension_numbers = #tpu.dot_dimension_numbers<[1], [0], [0], [1], [0, 0, 1, 1], [], []>} : vector<8x32xbf16>, vector<32x64xbf16>, vector<8x64xf32> -> vector<8x64xf32>
    %c0_61 = arith.constant 0 : index
    %c0_62 = arith.constant 0 : index
    %132 = vector.load %arg12[%c0_61, %c0_62] : memref<1x64xf32, #tpu.memory_space<vmem>>, vector<1x64xf32>
    %133 = vector.broadcast %132 : vector<1x64xf32> to vector<8x64xf32>
    %134 = arith.addf %131, %133 : vector<8x64xf32>
    %cst_63 = arith.constant 5.000000e-01 : f32
    %135 = vector.broadcast %cst_63 : f32 to vector<8x64xf32>
    %136 = arith.mulf %135, %134 : vector<8x64xf32>
    %cst_64 = arith.constant 4.471500e-02 : f32
    %137 = vector.broadcast %cst_64 : f32 to vector<8x64xf32>
    %138 = arith.mulf %137, %134 : vector<8x64xf32>
    %139 = arith.mulf %138, %134 : vector<8x64xf32>
    %140 = arith.mulf %139, %134 : vector<8x64xf32>
    %141 = arith.addf %134, %140 : vector<8x64xf32>
    %cst_65 = arith.constant 0.797884583 : f32
    %142 = vector.broadcast %cst_65 : f32 to vector<8x64xf32>
    %143 = arith.mulf %142, %141 : vector<8x64xf32>
    %144 = math.tanh %143 : vector<8x64xf32>
    %cst_66 = arith.constant 1.000000e+00 : f32
    %145 = vector.broadcast %cst_66 : f32 to vector<8x64xf32>
    %146 = arith.addf %145, %144 : vector<8x64xf32>
    %147 = arith.mulf %136, %146 : vector<8x64xf32>
    %148 = arith.truncf %147 : vector<8x64xf32> to vector<8x64xbf16>
    %c0_67 = arith.constant 0 : index
    %c0_68 = arith.constant 0 : index
    %149 = vector.load %arg13[%c0_67, %c0_68] : memref<64x32xbf16, #tpu.memory_space<vmem>>, vector<64x32xbf16>
    %cst_69 = arith.constant dense<0.000000e+00> : vector<8x32xf32>
    %150 = tpu.matmul %148, %149, %cst_69 {dimension_numbers = #tpu.dot_dimension_numbers<[1], [0], [0], [1], [0, 0, 1, 1], [], []>} : vector<8x64xbf16>, vector<64x32xbf16>, vector<8x32xf32> -> vector<8x32xf32>
    %c0_70 = arith.constant 0 : index
    %c0_71 = arith.constant 0 : index
    %151 = vector.load %arg14[%c0_70, %c0_71] : memref<1x32xf32, #tpu.memory_space<vmem>>, vector<1x32xf32>
    %152 = vector.broadcast %151 : vector<1x32xf32> to vector<8x32xf32>
    %153 = arith.addf %150, %152 : vector<8x32xf32>
    %154 = arith.addf %106, %153 : vector<8x32xf32>
    %c0_72 = arith.constant 0 : index
    %c0_73 = arith.constant 0 : index
    %c0_74 = arith.constant 0 : index
    %155 = vector.load %arg15[%c0_72, %c0_73, %c0_74] : memref<1x8x32xf32, #tpu.memory_space<vmem>>, vector<1x8x32xf32>
    %156 = vector.shape_cast %155 : vector<1x8x32xf32> to vector<8x32xf32>
    %157 = vector.shape_cast %154 : vector<8x32xf32> to vector<1x8x32xf32>
    tpu.vector_store %arg15[%c0_72, %c0_73, %c0_74], %157 {strides = array<i32>} : memref<1x8x32xf32, #tpu.memory_space<vmem>>, vector<1x8x32xf32>,
    return
  }
  func.func @transform_0(%arg0: i32, %arg1: i32) -> (i32, i32, i32) {
    %c0_i32 = arith.constant 0 : i32
    %c0_i32_0 = arith.constant 0 : i32
    %c0_i32_1 = arith.constant 0 : i32
    return %arg0, %c0_i32, %c0_i32_0 : i32, i32, i32
  }
  func.func @transform_1(%arg0: i32, %arg1: i32) -> (i32, i32) {
    %c0_i32 = arith.constant 0 : i32
    %c0_i32_0 = arith.constant 0 : i32
    %c0_i32_1 = arith.constant 0 : i32
    return %c0_i32, %c0_i32_0 : i32, i32
  }
  func.func @transform_2(%arg0: i32, %arg1: i32) -> (i32, i32) {
    %c0_i32 = arith.constant 0 : i32
    %c0_i32_0 = arith.constant 0 : i32
    %c0_i32_1 = arith.constant 0 : i32
    return %c0_i32, %c0_i32_0 : i32, i32
  }
  func.func @transform_3(%arg0: i32, %arg1: i32) -> (i32, i32) {
    %c0_i32 = arith.constant 0 : i32
    %c0_i32_0 = arith.constant 0 : i32
    %c0_i32_1 = arith.constant 0 : i32
    return %c0_i32, %c0_i32_0 : i32, i32
  }
  func.func @transform_4(%arg0: i32, %arg1: i32) -> (i32, i32) {
    %c0_i32 = arith.constant 0 : i32
    %c0_i32_0 = arith.constant 0 : i32
    %c0_i32_1 = arith.constant 0 : i32
    return %c0_i32, %c0_i32_0 : i32, i32
  }
  func.func @transform_5(%arg0: i32, %arg1: i32) -> (i32, i32) {
    %c0_i32 = arith.constant 0 : i32
    %c0_i32_0 = arith.constant 0 : i32
    %c0_i32_1 = arith.constant 0 : i32
    return %c0_i32, %c0_i32_0 : i32, i32
  }
  func.func @transform_6(%arg0: i32, %arg1: i32) -> (i32, i32) {
    %c0_i32 = arith.constant 0 : i32
    %c0_i32_0 = arith.constant 0 : i32
    %c0_i32_1 = arith.constant 0 : i32
    return %c0_i32, %c0_i32_0 : i32, i32
  }
  func.func @transform_7(%arg0: i32, %arg1: i32) -> (i32, i32) {
    %c0_i32 = arith.constant 0 : i32
    %c0_i32_0 = arith.constant 0 : i32
    %c0_i32_1 = arith.constant 0 : i32
    return %c0_i32, %c0_i32_0 : i32, i32
  }
  func.func @transform_8(%arg0: i32, %arg1: i32) -> (i32, i32) {
    %c0_i32 = arith.constant 0 : i32
    %c0_i32_0 = arith.constant 0 : i32
    %c0_i32_1 = arith.constant 0 : i32
    return %c0_i32, %c0_i32_0 : i32, i32
  }
  func.func @transform_9(%arg0: i32, %arg1: i32) -> (i32, i32) {
    %c0_i32 = arith.constant 0 : i32
    %c0_i32_0 = arith.constant 0 : i32
    %c0_i32_1 = arith.constant 0 : i32
    return %c0_i32, %c0_i32_0 : i32, i32
  }
  func.func @transform_10(%arg0: i32, %arg1: i32) -> (i32, i32) {
    %c0_i32 = arith.constant 0 : i32
    %c0_i32_0 = arith.constant 0 : i32
    %c0_i32_1 = arith.constant 0 : i32
    return %c0_i32, %c0_i32_0 : i32, i32
  }
  func.func @transform_11(%arg0: i32, %arg1: i32) -> (i32, i32) {
    %c0_i32 = arith.constant 0 : i32
    %c0_i32_0 = arith.constant 0 : i32
    %c0_i32_1 = arith.constant 0 : i32
    return %c0_i32, %c0_i32_0 : i32, i32
  }
  func.func @transform_12(%arg0: i32, %arg1: i32) -> (i32, i32) {
    %c0_i32 = arith.constant 0 : i32
    %c0_i32_0 = arith.constant 0 : i32
    %c0_i32_1 = arith.constant 0 : i32
    return %c0_i32, %c0_i32_0 : i32, i32
  }
  func.func @transform_13(%arg0: i32, %arg1: i32) -> (i32, i32, i32) {
    %c0_i32 = arith.constant 0 : i32
    %c0_i32_0 = arith.constant 0 : i32
    return %arg0, %arg1, %c0_i32 : i32, i32, i32
  }
  func.func @transform_14(%arg0: i32, %arg1: i32) -> (i32, i32, i32, i32) {
    %c0_i32 = arith.constant 0 : i32
    %c0_i32_0 = arith.constant 0 : i32
    %c0_i32_1 = arith.constant 0 : i32
    return %arg0, %c0_i32, %arg1, %c0_i32_0 : i32, i32, i32, i32
  }
}

module attributes {stable_mosaic.version = 11 : i64} {
  func.func @encoder_kernel(%arg0: i32, %arg1: i32, %arg2: memref<1x8x32xf32, #tpu.memory_space<vmem>>, %arg3: memref<1x32xf32, #tpu.memory_space<vmem>>, %arg4: memref<1x32xf32, #tpu.memory_space<vmem>>, %arg5: memref<32x96xbf16, #tpu.memory_space<vmem>>, %arg6: memref<1x96xf32, #tpu.memory_space<vmem>>, %arg7: memref<32x32xbf16, #tpu.memory_space<vmem>>, %arg8: memref<1x32xf32, #tpu.memory_space<vmem>>, %arg9: memref<1x32xf32, #tpu.memory_space<vmem>>, %arg10: memref<1x32xf32, #tpu.memory_space<vmem>>, %arg11: memref<32x64xbf16, #tpu.memory_space<vmem>>, %arg12: memref<1x64xf32, #tpu.memory_space<vmem>>, %arg13: memref<64x32xbf16, #tpu.memory_space<vmem>>, %arg14: memref<1x32xf32, #tpu.memory_space<vmem>>, %arg15: memref<1x8x32xf32, #tpu.memory_space<vmem>>, %arg16: memref<1x4x8x8xf32, #tpu.memory_space<vmem>>, %arg17: memref<8x96xbf16, #tpu.memory_space<vmem>>, %arg18: memref<8x32xf32, #tpu.memory_space<vmem>>) attributes {dimension_semantics = [#tpu.dimension_semantics<parallel>, #tpu.dimension_semantics<arbitrary>], iteration_bounds = array<i64: 2, 1>, scalar_prefetch = 0 : i64, scratch_operands = 2 : i64, tpu.core_type = #tpu.core_type<tc>, window_params = [{transform_indices = @transform_0, window_bounds = array<i64: 1, 8, 32>}, {pipeline_mode = #tpu.pipeline_mode<synchronous>, transform_indices = @transform_1, window_bounds = array<i64: 1, 32>}, {pipeline_mode = #tpu.pipeline_mode<synchronous>, transform_indices = @transform_2, window_bounds = array<i64: 1, 32>}, {pipeline_mode = #tpu.pipeline_mode<synchronous>, transform_indices = @transform_3, window_bounds = array<i64: 32, 96>}, {pipeline_mode = #tpu.pipeline_mode<synchronous>, transform_indices = @transform_4, window_bounds = array<i64: 1, 96>}, {pipeline_mode = #tpu.pipeline_mode<synchronous>, transform_indices = @transform_5, window_bounds = array<i64: 32, 32>}, {pipeline_mode = #tpu.pipeline_mode<synchronous>, transform_indices = @transform_6, window_bounds = array<i64: 1, 32>}, {pipeline_mode = #tpu.pipeline_mode<synchronous>, transform_indices = @transform_7, window_bounds = array<i64: 1, 32>}, {pipeline_mode = #tpu.pipeline_mode<synchronous>, transform_indices = @transform_8, window_bounds = array<i64: 1, 32>}, {pipeline_mode = #tpu.pipeline_mode<synchronous>, transform_indices = @transform_9, window_bounds = array<i64: 32, 64>}, {pipeline_mode = #tpu.pipeline_mode<synchronous>, transform_indices = @transform_10, window_bounds = array<i64: 1, 64>}, {pipeline_mode = #tpu.pipeline_mode<synchronous>, transform_indices = @transform_11, window_bounds = array<i64: 64, 32>}, {pipeline_mode = #tpu.pipeline_mode<synchronous>, transform_indices = @transform_12, window_bounds = array<i64: 1, 32>}, {transform_indices = @transform_13, window_bounds = array<i64: 1, 8, 32>}, {transform_indices = @transform_14, window_bounds = array<i64: 1, 4, 8, 8>}]} {
    %c0_i32 = arith.constant 0 : i32
    %0 = arith.cmpi eq, %arg1, %c0_i32 : i32
    %1 = arith.extui %0 : i1 to i32
    %c0_i32_0 = arith.constant 0 : i32
    %2 = arith.cmpi ne, %1, %c0_i32_0 : i32
    scf.if %2 {
      %c0_75 = arith.constant 0 : index
      %c0_76 = arith.constant 0 : index
      %c0_77 = arith.constant 0 : index
      %158 = vector.load %arg2[%c0_75, %c0_76, %c0_77] : memref<1x8x32xf32, #tpu.memory_space<vmem>>, vector<1x8x32xf32>
      %159 = vector.shape_cast %158 : vector<1x8x32xf32> to vector<8x32xf32>
      %c0_78 = arith.constant 0 : index
      %c0_79 = arith.constant 0 : index
      %160 = vector.load %arg3[%c0_78, %c0_79] : memref<1x32xf32, #tpu.memory_space<vmem>>, vector<1x32xf32>
      %c0_80 = arith.constant 0 : index
      %c0_81 = arith.constant 0 : index
      %161 = vector.load %arg4[%c0_80, %c0_81] : memref<1x32xf32, #tpu.memory_space<vmem>>, vector<1x32xf32>
      %cst_82 = arith.constant dense<0.000000e+00> : vector<8xf32>
      %162 = vector.multi_reduction <add>, %159, %cst_82 [1] : vector<8x32xf32> to vector<8xf32>
      %163 = vector.shape_cast %162 : vector<8xf32> to vector<8x1xf32>
      %cst_83 = arith.constant 3.200000e+01 : f32
      %164 = vector.broadcast %cst_83 : f32 to vector<8x1xf32>
      %165 = arith.divf %163, %164 : vector<8x1xf32>
      %166 = vector.broadcast %165 : vector<8x1xf32> to vector<8x32xf32>
      %167 = arith.subf %159, %166 : vector<8x32xf32>
      %168 = arith.mulf %167, %167 : vector<8x32xf32>
      %cst_84 = arith.constant dense<0.000000e+00> : vector<8xf32>
      %169 = vector.multi_reduction <add>, %168, %cst_84 [1] : vector<8x32xf32> to vector<8xf32>
      %170 = vector.shape_cast %169 : vector<8xf32> to vector<8x1xf32>
      %cst_85 = arith.constant 3.200000e+01 : f32
      %171 = vector.broadcast %cst_85 : f32 to vector<8x1xf32>
      %172 = arith.divf %170, %171 : vector<8x1xf32>
      %cst_86 = arith.constant 9.99999974E-6 : f32
      %173 = vector.broadcast %cst_86 : f32 to vector<8x1xf32>
      %174 = arith.addf %172, %173 : vector<8x1xf32>
      %175 = math.rsqrt %174 : vector<8x1xf32>
      %176 = vector.broadcast %175 : vector<8x1xf32> to vector<8x32xf32>
      %177 = arith.mulf %167, %176 : vector<8x32xf32>
      %178 = vector.broadcast %160 : vector<1x32xf32> to vector<8x32xf32>
      %179 = arith.mulf %177, %178 : vector<8x32xf32>
      %180 = vector.broadcast %161 : vector<1x32xf32> to vector<8x32xf32>
      %181 = arith.addf %179, %180 : vector<8x32xf32>
      %182 = arith.truncf %181 : vector<8x32xf32> to vector<8x32xbf16>
      %c0_87 = arith.constant 0 : index
      %c0_88 = arith.constant 0 : index
      %183 = vector.load %arg5[%c0_87, %c0_88] : memref<32x96xbf16, #tpu.memory_space<vmem>>, vector<32x96xbf16>
      %cst_89 = arith.constant dense<0.000000e+00> : vector<8x96xf32>
      %184 = tpu.matmul %182, %183, %cst_89 {dimension_numbers = #tpu.dot_dimension_numbers<[1], [0], [0], [1], [0, 0, 1, 1], [], []>} : vector<8x32xbf16>, vector<32x96xbf16>, vector<8x96xf32> -> vector<8x96xf32>
      %c0_90 = arith.constant 0 : index
      %c0_91 = arith.constant 0 : index
      %185 = vector.load %arg6[%c0_90, %c0_91] : memref<1x96xf32, #tpu.memory_space<vmem>>, vector<1x96xf32>
      %186 = vector.broadcast %185 : vector<1x96xf32> to vector<8x96xf32>
      %187 = arith.addf %184, %186 : vector<8x96xf32>
      %188 = arith.truncf %187 : vector<8x96xf32> to vector<8x96xbf16>
      %c0_92 = arith.constant 0 : index
      %c0_93 = arith.constant 0 : index
      %189 = vector.load %arg17[%c0_92, %c0_93] : memref<8x96xbf16, #tpu.memory_space<vmem>>, vector<8x96xbf16>
      tpu.vector_store %arg17[%c0_92, %c0_93], %188 {strides = array<i32>} : memref<8x96xbf16, #tpu.memory_space<vmem>>, vector<8x96xbf16>,
    } else {
    }
    %c8_i32 = arith.constant 8 : i32
    %3 = arith.muli %arg1, %c8_i32 : i32
    %4 = tpu.assume_multiple %3, 8 : i32
    %c0 = arith.constant 0 : index
    %5 = arith.index_cast %4 : i32 to index
    %c0_1 = arith.constant 0 : index
    %6 = vector.load %arg2[%c0, %5, %c0_1] : memref<1x8x32xf32, #tpu.memory_space<vmem>>, vector<1x8x32xf32>
    %7 = vector.shape_cast %6 : vector<1x8x32xf32> to vector<8x32xf32>
    %8 = arith.index_cast %4 : i32 to index
    %c0_2 = arith.constant 0 : index
    %9 = vector.load %arg17[%8, %c0_2] : memref<8x96xbf16, #tpu.memory_space<vmem>>, vector<8x96xbf16>
    %c0_3 = arith.constant 0 : index
    %c0_4 = arith.constant 0 : index
    %10 = vector.load %arg17[%c0_3, %c0_4] : memref<8x96xbf16, #tpu.memory_space<vmem>>, vector<8x96xbf16>
    %11 = vector.extract_strided_slice %9 {offsets = [0, 0], sizes = [8, 8], strides = [1, 1]} : vector<8x96xbf16> to vector<8x8xbf16>
    %12 = vector.extract_strided_slice %10 {offsets = [0, 32], sizes = [8, 8], strides = [1, 1]} : vector<8x96xbf16> to vector<8x8xbf16>
    %13 = vector.extract_strided_slice %10 {offsets = [0, 64], sizes = [8, 8], strides = [1, 1]} : vector<8x96xbf16> to vector<8x8xbf16>
    %cst = arith.constant dense<0.000000e+00> : vector<8x8xf32>
    %14 = tpu.matmul %11, %12, %cst {dimension_numbers = #tpu.dot_dimension_numbers<[1], [1], [0], [0], [0, 0, 1, 0], [], []>} : vector<8x8xbf16>, vector<8x8xbf16>, vector<8x8xf32> -> vector<8x8xf32>
    %cst_5 = arith.constant 0.353553385 : f32
    %15 = vector.broadcast %cst_5 : f32 to vector<8x8xf32>
    %16 = arith.mulf %14, %15 : vector<8x8xf32>
    %cst_6 = arith.constant dense<0xFF800000> : vector<8xf32>
    %17 = vector.multi_reduction <maximumf>, %16, %cst_6 [1] : vector<8x8xf32> to vector<8xf32>
    %18 = vector.shape_cast %17 : vector<8xf32> to vector<8x1xf32>
    %19 = vector.broadcast %18 : vector<8x1xf32> to vector<8x8xf32>
    %20 = arith.subf %16, %19 : vector<8x8xf32>
    %21 = math.exp %20 : vector<8x8xf32>
    %cst_7 = arith.constant dense<0.000000e+00> : vector<8xf32>
    %22 = vector.multi_reduction <add>, %21, %cst_7 [1] : vector<8x8xf32> to vector<8xf32>
    %23 = vector.shape_cast %22 : vector<8xf32> to vector<8x1xf32>
    %24 = tpu.reciprocal %23 {approx = true} : vector<8x1xf32> -> vector<8x1xf32>
    %25 = vector.broadcast %24 : vector<8x1xf32> to vector<8x8xf32>
    %26 = arith.mulf %21, %25 : vector<8x8xf32>
    %c0_8 = arith.constant 0 : index
    %c0_9 = arith.constant 0 : index
    %c0_10 = arith.constant 0 : index
    %c0_11 = arith.constant 0 : index
    %27 = vector.load %arg16[%c0_8, %c0_9, %c0_10, %c0_11] : memref<1x4x8x8xf32, #tpu.memory_space<vmem>>, vector<1x1x8x8xf32>
    %28 = vector.shape_cast %27 : vector<1x1x8x8xf32> to vector<8x8xf32>
    %29 = vector.shape_cast %26 : vector<8x8xf32> to vector<1x1x8x8xf32>
    tpu.vector_store %arg16[%c0_8, %c0_9, %c0_10, %c0_11], %29 {strides = array<i32>} : memref<1x4x8x8xf32, #tpu.memory_space<vmem>>, vector<1x1x8x8xf32>,
    %30 = arith.truncf %26 : vector<8x8xf32> to vector<8x8xbf16>
    %cst_12 = arith.constant dense<0.000000e+00> : vector<8x8xf32>
    %31 = tpu.matmul %30, %13, %cst_12 {dimension_numbers = #tpu.dot_dimension_numbers<[1], [0], [0], [1], [0, 0, 1, 1], [], []>} : vector<8x8xbf16>, vector<8x8xbf16>, vector<8x8xf32> -> vector<8x8xf32>
    %c0_13 = arith.constant 0 : index
    %c0_14 = arith.constant 0 : index
    %32 = vector.load %arg18[%c0_13, %c0_14] : memref<8x32xf32, #tpu.memory_space<vmem>>, vector<8x8xf32>
    tpu.vector_store %arg18[%c0_13, %c0_14], %31 {strides = array<i32>} : memref<8x32xf32, #tpu.memory_space<vmem>>, vector<8x8xf32>,
    %33 = vector.extract_strided_slice %9 {offsets = [0, 8], sizes = [8, 8], strides = [1, 1]} : vector<8x96xbf16> to vector<8x8xbf16>
    %34 = vector.extract_strided_slice %10 {offsets = [0, 40], sizes = [8, 8], strides = [1, 1]} : vector<8x96xbf16> to vector<8x8xbf16>
    %35 = vector.extract_strided_slice %10 {offsets = [0, 72], sizes = [8, 8], strides = [1, 1]} : vector<8x96xbf16> to vector<8x8xbf16>
    %cst_15 = arith.constant dense<0.000000e+00> : vector<8x8xf32>
    %36 = tpu.matmul %33, %34, %cst_15 {dimension_numbers = #tpu.dot_dimension_numbers<[1], [1], [0], [0], [0, 0, 1, 0], [], []>} : vector<8x8xbf16>, vector<8x8xbf16>, vector<8x8xf32> -> vector<8x8xf32>
    %cst_16 = arith.constant 0.353553385 : f32
    %37 = vector.broadcast %cst_16 : f32 to vector<8x8xf32>
    %38 = arith.mulf %36, %37 : vector<8x8xf32>
    %cst_17 = arith.constant dense<0xFF800000> : vector<8xf32>
    %39 = vector.multi_reduction <maximumf>, %38, %cst_17 [1] : vector<8x8xf32> to vector<8xf32>
    %40 = vector.shape_cast %39 : vector<8xf32> to vector<8x1xf32>
    %41 = vector.broadcast %40 : vector<8x1xf32> to vector<8x8xf32>
    %42 = arith.subf %38, %41 : vector<8x8xf32>
    %43 = math.exp %42 : vector<8x8xf32>
    %cst_18 = arith.constant dense<0.000000e+00> : vector<8xf32>
    %44 = vector.multi_reduction <add>, %43, %cst_18 [1] : vector<8x8xf32> to vector<8xf32>
    %45 = vector.shape_cast %44 : vector<8xf32> to vector<8x1xf32>
    %46 = tpu.reciprocal %45 {approx = true} : vector<8x1xf32> -> vector<8x1xf32>
    %47 = vector.broadcast %46 : vector<8x1xf32> to vector<8x8xf32>
    %48 = arith.mulf %43, %47 : vector<8x8xf32>
    %c0_19 = arith.constant 0 : index
    %c1 = arith.constant 1 : index
    %c0_20 = arith.constant 0 : index
    %c0_21 = arith.constant 0 : index
    %49 = vector.load %arg16[%c0_19, %c1, %c0_20, %c0_21] : memref<1x4x8x8xf32, #tpu.memory_space<vmem>>, vector<1x1x8x8xf32>
    %50 = vector.shape_cast %49 : vector<1x1x8x8xf32> to vector<8x8xf32>
    %51 = vector.shape_cast %48 : vector<8x8xf32> to vector<1x1x8x8xf32>
    tpu.vector_store %arg16[%c0_19, %c1, %c0_20, %c0_21], %51 {strides = array<i32>} : memref<1x4x8x8xf32, #tpu.memory_space<vmem>>, vector<1x1x8x8xf32>,
    %52 = arith.truncf %48 : vector<8x8xf32> to vector<8x8xbf16>
    %cst_22 = arith.constant dense<0.000000e+00> : vector<8x8xf32>
    %53 = tpu.matmul %52, %35, %cst_22 {dimension_numbers = #tpu.dot_dimension_numbers<[1], [0], [0], [1], [0, 0, 1, 1], [], []>} : vector<8x8xbf16>, vector<8x8xbf16>, vector<8x8xf32> -> vector<8x8xf32>
    %c0_23 = arith.constant 0 : index
    %c8 = arith.constant 8 : index
    %54 = vector.load %arg18[%c0_23, %c8] : memref<8x32xf32, #tpu.memory_space<vmem>>, vector<8x8xf32>
    tpu.vector_store %arg18[%c0_23, %c8], %53 {strides = array<i32>} : memref<8x32xf32, #tpu.memory_space<vmem>>, vector<8x8xf32>,
    %55 = vector.extract_strided_slice %9 {offsets = [0, 16], sizes = [8, 8], strides = [1, 1]} : vector<8x96xbf16> to vector<8x8xbf16>
    %56 = vector.extract_strided_slice %10 {offsets = [0, 48], sizes = [8, 8], strides = [1, 1]} : vector<8x96xbf16> to vector<8x8xbf16>
    %57 = vector.extract_strided_slice %10 {offsets = [0, 80], sizes = [8, 8], strides = [1, 1]} : vector<8x96xbf16> to vector<8x8xbf16>
    %cst_24 = arith.constant dense<0.000000e+00> : vector<8x8xf32>
    %58 = tpu.matmul %55, %56, %cst_24 {dimension_numbers = #tpu.dot_dimension_numbers<[1], [1], [0], [0], [0, 0, 1, 0], [], []>} : vector<8x8xbf16>, vector<8x8xbf16>, vector<8x8xf32> -> vector<8x8xf32>
    %cst_25 = arith.constant 0.353553385 : f32
    %59 = vector.broadcast %cst_25 : f32 to vector<8x8xf32>
    %60 = arith.mulf %58, %59 : vector<8x8xf32>
    %cst_26 = arith.constant dense<0xFF800000> : vector<8xf32>
    %61 = vector.multi_reduction <maximumf>, %60, %cst_26 [1] : vector<8x8xf32> to vector<8xf32>
    %62 = vector.shape_cast %61 : vector<8xf32> to vector<8x1xf32>
    %63 = vector.broadcast %62 : vector<8x1xf32> to vector<8x8xf32>
    %64 = arith.subf %60, %63 : vector<8x8xf32>
    %65 = math.exp %64 : vector<8x8xf32>
    %cst_27 = arith.constant dense<0.000000e+00> : vector<8xf32>
    %66 = vector.multi_reduction <add>, %65, %cst_27 [1] : vector<8x8xf32> to vector<8xf32>
    %67 = vector.shape_cast %66 : vector<8xf32> to vector<8x1xf32>
    %68 = tpu.reciprocal %67 {approx = true} : vector<8x1xf32> -> vector<8x1xf32>
    %69 = vector.broadcast %68 : vector<8x1xf32> to vector<8x8xf32>
    %70 = arith.mulf %65, %69 : vector<8x8xf32>
    %c0_28 = arith.constant 0 : index
    %c2 = arith.constant 2 : index
    %c0_29 = arith.constant 0 : index
    %c0_30 = arith.constant 0 : index
    %71 = vector.load %arg16[%c0_28, %c2, %c0_29, %c0_30] : memref<1x4x8x8xf32, #tpu.memory_space<vmem>>, vector<1x1x8x8xf32>
    %72 = vector.shape_cast %71 : vector<1x1x8x8xf32> to vector<8x8xf32>
    %73 = vector.shape_cast %70 : vector<8x8xf32> to vector<1x1x8x8xf32>
    tpu.vector_store %arg16[%c0_28, %c2, %c0_29, %c0_30], %73 {strides = array<i32>} : memref<1x4x8x8xf32, #tpu.memory_space<vmem>>, vector<1x1x8x8xf32>,
    %74 = arith.truncf %70 : vector<8x8xf32> to vector<8x8xbf16>
    %cst_31 = arith.constant dense<0.000000e+00> : vector<8x8xf32>
    %75 = tpu.matmul %74, %57, %cst_31 {dimension_numbers = #tpu.dot_dimension_numbers<[1], [0], [0], [1], [0, 0, 1, 1], [], []>} : vector<8x8xbf16>, vector<8x8xbf16>, vector<8x8xf32> -> vector<8x8xf32>
    %c0_32 = arith.constant 0 : index
    %c16 = arith.constant 16 : index
    %76 = vector.load %arg18[%c0_32, %c16] : memref<8x32xf32, #tpu.memory_space<vmem>>, vector<8x8xf32>
    tpu.vector_store %arg18[%c0_32, %c16], %75 {strides = array<i32>} : memref<8x32xf32, #tpu.memory_space<vmem>>, vector<8x8xf32>,
    %77 = vector.extract_strided_slice %9 {offsets = [0, 24], sizes = [8, 8], strides = [1, 1]} : vector<8x96xbf16> to vector<8x8xbf16>
    %78 = vector.extract_strided_slice %10 {offsets = [0, 56], sizes = [8, 8], strides = [1, 1]} : vector<8x96xbf16> to vector<8x8xbf16>
    %79 = vector.extract_strided_slice %10 {offsets = [0, 88], sizes = [8, 8], strides = [1, 1]} : vector<8x96xbf16> to vector<8x8xbf16>
    %cst_33 = arith.constant dense<0.000000e+00> : vector<8x8xf32>
    %80 = tpu.matmul %77, %78, %cst_33 {dimension_numbers = #tpu.dot_dimension_numbers<[1], [1], [0], [0], [0, 0, 1, 0], [], []>} : vector<8x8xbf16>, vector<8x8xbf16>, vector<8x8xf32> -> vector<8x8xf32>
    %cst_34 = arith.constant 0.353553385 : f32
    %81 = vector.broadcast %cst_34 : f32 to vector<8x8xf32>
    %82 = arith.mulf %80, %81 : vector<8x8xf32>
    %cst_35 = arith.constant dense<0xFF800000> : vector<8xf32>
    %83 = vector.multi_reduction <maximumf>, %82, %cst_35 [1] : vector<8x8xf32> to vector<8xf32>
    %84 = vector.shape_cast %83 : vector<8xf32> to vector<8x1xf32>
    %85 = vector.broadcast %84 : vector<8x1xf32> to vector<8x8xf32>
    %86 = arith.subf %82, %85 : vector<8x8xf32>
    %87 = math.exp %86 : vector<8x8xf32>
    %cst_36 = arith.constant dense<0.000000e+00> : vector<8xf32>
    %88 = vector.multi_reduction <add>, %87, %cst_36 [1] : vector<8x8xf32> to vector<8xf32>
    %89 = vector.shape_cast %88 : vector<8xf32> to vector<8x1xf32>
    %90 = tpu.reciprocal %89 {approx = true} : vector<8x1xf32> -> vector<8x1xf32>
    %91 = vector.broadcast %90 : vector<8x1xf32> to vector<8x8xf32>
    %92 = arith.mulf %87, %91 : vector<8x8xf32>
    %c0_37 = arith.constant 0 : index
    %c3 = arith.constant 3 : index
    %c0_38 = arith.constant 0 : index
    %c0_39 = arith.constant 0 : index
    %93 = vector.load %arg16[%c0_37, %c3, %c0_38, %c0_39] : memref<1x4x8x8xf32, #tpu.memory_space<vmem>>, vector<1x1x8x8xf32>
    %94 = vector.shape_cast %93 : vector<1x1x8x8xf32> to vector<8x8xf32>
    %95 = vector.shape_cast %92 : vector<8x8xf32> to vector<1x1x8x8xf32>
    tpu.vector_store %arg16[%c0_37, %c3, %c0_38, %c0_39], %95 {strides = array<i32>} : memref<1x4x8x8xf32, #tpu.memory_space<vmem>>, vector<1x1x8x8xf32>,
    %96 = arith.truncf %92 : vector<8x8xf32> to vector<8x8xbf16>
    %cst_40 = arith.constant dense<0.000000e+00> : vector<8x8xf32>
    %97 = tpu.matmul %96, %79, %cst_40 {dimension_numbers = #tpu.dot_dimension_numbers<[1], [0], [0], [1], [0, 0, 1, 1], [], []>} : vector<8x8xbf16>, vector<8x8xbf16>, vector<8x8xf32> -> vector<8x8xf32>
    %c0_41 = arith.constant 0 : index
    %c24 = arith.constant 24 : index
    %98 = vector.load %arg18[%c0_41, %c24] : memref<8x32xf32, #tpu.memory_space<vmem>>, vector<8x8xf32>
    tpu.vector_store %arg18[%c0_41, %c24], %97 {strides = array<i32>} : memref<8x32xf32, #tpu.memory_space<vmem>>, vector<8x8xf32>,
    %c0_42 = arith.constant 0 : index
    %c0_43 = arith.constant 0 : index
    %99 = vector.load %arg18[%c0_42, %c0_43] : memref<8x32xf32, #tpu.memory_space<vmem>>, vector<8x32xf32>
    %100 = arith.truncf %99 : vector<8x32xf32> to vector<8x32xbf16>
    %c0_44 = arith.constant 0 : index
    %c0_45 = arith.constant 0 : index
    %101 = vector.load %arg7[%c0_44, %c0_45] : memref<32x32xbf16, #tpu.memory_space<vmem>>, vector<32x32xbf16>
    %cst_46 = arith.constant dense<0.000000e+00> : vector<8x32xf32>
    %102 = tpu.matmul %100, %101, %cst_46 {dimension_numbers = #tpu.dot_dimension_numbers<[1], [0], [0], [1], [0, 0, 1, 1], [], []>} : vector<8x32xbf16>, vector<32x32xbf16>, vector<8x32xf32> -> vector<8x32xf32>
    %c0_47 = arith.constant 0 : index
    %c0_48 = arith.constant 0 : index
    %103 = vector.load %arg8[%c0_47, %c0_48] : memref<1x32xf32, #tpu.memory_space<vmem>>, vector<1x32xf32>
    %104 = vector.broadcast %103 : vector<1x32xf32> to vector<8x32xf32>
    %105 = arith.addf %102, %104 : vector<8x32xf32>
    %106 = arith.addf %7, %105 : vector<8x32xf32>
    %c0_49 = arith.constant 0 : index
    %c0_50 = arith.constant 0 : index
    %107 = vector.load %arg9[%c0_49, %c0_50] : memref<1x32xf32, #tpu.memory_space<vmem>>, vector<1x32xf32>
    %c0_51 = arith.constant 0 : index
    %c0_52 = arith.constant 0 : index
    %108 = vector.load %arg10[%c0_51, %c0_52] : memref<1x32xf32, #tpu.memory_space<vmem>>, vector<1x32xf32>
    %cst_53 = arith.constant dense<0.000000e+00> : vector<8xf32>
    %109 = vector.multi_reduction <add>, %106, %cst_53 [1] : vector<8x32xf32> to vector<8xf32>
    %110 = vector.shape_cast %109 : vector<8xf32> to vector<8x1xf32>
    %cst_54 = arith.constant 3.200000e+01 : f32
    %111 = vector.broadcast %cst_54 : f32 to vector<8x1xf32>
    %112 = arith.divf %110, %111 : vector<8x1xf32>
    %113 = vector.broadcast %112 : vector<8x1xf32> to vector<8x32xf32>
    %114 = arith.subf %106, %113 : vector<8x32xf32>
    %115 = arith.mulf %114, %114 : vector<8x32xf32>
    %cst_55 = arith.constant dense<0.000000e+00> : vector<8xf32>
    %116 = vector.multi_reduction <add>, %115, %cst_55 [1] : vector<8x32xf32> to vector<8xf32>
    %117 = vector.shape_cast %116 : vector<8xf32> to vector<8x1xf32>
    %cst_56 = arith.constant 3.200000e+01 : f32
    %118 = vector.broadcast %cst_56 : f32 to vector<8x1xf32>
    %119 = arith.divf %117, %118 : vector<8x1xf32>
    %cst_57 = arith.constant 9.99999974E-6 : f32
    %120 = vector.broadcast %cst_57 : f32 to vector<8x1xf32>
    %121 = arith.addf %119, %120 : vector<8x1xf32>
    %122 = math.rsqrt %121 : vector<8x1xf32>
    %123 = vector.broadcast %122 : vector<8x1xf32> to vector<8x32xf32>
    %124 = arith.mulf %114, %123 : vector<8x32xf32>
    %125 = vector.broadcast %107 : vector<1x32xf32> to vector<8x32xf32>
    %126 = arith.mulf %124, %125 : vector<8x32xf32>
    %127 = vector.broadcast %108 : vector<1x32xf32> to vector<8x32xf32>
    %128 = arith.addf %126, %127 : vector<8x32xf32>
    %129 = arith.truncf %128 : vector<8x32xf32> to vector<8x32xbf16>
    %c0_58 = arith.constant 0 : index
    %c0_59 = arith.constant 0 : index
    %130 = vector.load %arg11[%c0_58, %c0_59] : memref<32x64xbf16, #tpu.memory_space<vmem>>, vector<32x64xbf16>
    %cst_60 = arith.constant dense<0.000000e+00> : vector<8x64xf32>
    %131 = tpu.matmul %129, %130, %cst_60 {dimension_numbers = #tpu.dot_dimension_numbers<[1], [0], [0], [1], [0, 0, 1, 1], [], []>} : vector<8x32xbf16>, vector<32x64xbf16>, vector<8x64xf32> -> vector<8x64xf32>
    %c0_61 = arith.constant 0 : index
    %c0_62 = arith.constant 0 : index
    %132 = vector.load %arg12[%c0_61, %c0_62] : memref<1x64xf32, #tpu.memory_space<vmem>>, vector<1x64xf32>
    %133 = vector.broadcast %132 : vector<1x64xf32> to vector<8x64xf32>
    %134 = arith.addf %131, %133 : vector<8x64xf32>
    %cst_63 = arith.constant 5.000000e-01 : f32
    %135 = vector.broadcast %cst_63 : f32 to vector<8x64xf32>
    %136 = arith.mulf %135, %134 : vector<8x64xf32>
    %cst_64 = arith.constant 4.471500e-02 : f32
    %137 = vector.broadcast %cst_64 : f32 to vector<8x64xf32>
    %138 = arith.mulf %137, %134 : vector<8x64xf32>
    %139 = arith.mulf %138, %134 : vector<8x64xf32>
    %140 = arith.mulf %139, %134 : vector<8x64xf32>
    %141 = arith.addf %134, %140 : vector<8x64xf32>
    %cst_65 = arith.constant 0.797884583 : f32
    %142 = vector.broadcast %cst_65 : f32 to vector<8x64xf32>
    %143 = arith.mulf %142, %141 : vector<8x64xf32>
    %144 = math.tanh %143 : vector<8x64xf32>
    %cst_66 = arith.constant 1.000000e+00 : f32
    %145 = vector.broadcast %cst_66 : f32 to vector<8x64xf32>
    %146 = arith.addf %145, %144 : vector<8x64xf32>
    %147 = arith.mulf %136, %146 : vector<8x64xf32>
    %148 = arith.truncf %147 : vector<8x64xf32> to vector<8x64xbf16>
    %c0_67 = arith.constant 0 : index
    %c0_68 = arith.constant 0 : index
    %149 = vector.load %arg13[%c0_67, %c0_68] : memref<64x32xbf16, #tpu.memory_space<vmem>>, vector<64x32xbf16>
    %cst_69 = arith.constant dense<0.000000e+00> : vector<8x32xf32>
    %150 = tpu.matmul %148, %149, %cst_69 {dimension_numbers = #tpu.dot_dimension_numbers<[1], [0], [0], [1], [0, 0, 1, 1], [], []>} : vector<8x64xbf16>, vector<64x32xbf16>, vector<8x32xf32> -> vector<8x32xf32>
    %c0_70 = arith.constant 0 : index
    %c0_71 = arith.constant 0 : index
    %151 = vector.load %arg14[%c0_70, %c0_71] : memref<1x32xf32, #tpu.memory_space<vmem>>, vector<1x32xf32>
    %152 = vector.broadcast %151 : vector<1x32xf32> to vector<8x32xf32>
    %153 = arith.addf %150, %152 : vector<8x32xf32>
    %154 = arith.addf %106, %153 : vector<8x32xf32>
    %c0_72 = arith.constant 0 : index
    %c0_73 = arith.constant 0 : index
    %c0_74 = arith.constant 0 : index
    %155 = vector.load %arg15[%c0_72, %c0_73, %c0_74] : memref<1x8x32xf32, #tpu.memory_space<vmem>>, vector<1x8x32xf32>
    %156 = vector.shape_cast %155 : vector<1x8x32xf32> to vector<8x32xf32>
    %157 = vector.shape_cast %154 : vector<8x32xf32> to vector<1x8x32xf32>
    tpu.vector_store %arg15[%c0_72, %c0_73, %c0_74], %157 {strides = array<i32>} : memref<1x8x32xf32, #tpu.memory_space<vmem>>, vector<1x8x32xf32>,
    return
  }
  func.func @transform_0(%arg0: i32, %arg1: i32) -> (i32, i32, i32) {
    %c0_i32 = arith.constant 0 : i32
    %c0_i32_0 = arith.constant 0 : i32
    %c0_i32_1 = arith.constant 0 : i32
    return %arg0, %c0_i32, %c0_i32_0 : i32, i32, i32
  }
  func.func @transform_1(%arg0: i32, %arg1: i32) -> (i32, i32) {
    %c0_i32 = arith.constant 0 : i32
    %c0_i32_0 = arith.constant 0 : i32
    %c0_i32_1 = arith.constant 0 : i32
    return %c0_i32, %c0_i32_0 : i32, i32
  }
  func.func @transform_2(%arg0: i32, %arg1: i32) -> (i32, i32) {
    %c0_i32 = arith.constant 0 : i32
    %c0_i32_0 = arith.constant 0 : i32
    %c0_i32_1 = arith.constant 0 : i32
    return %c0_i32, %c0_i32_0 : i32, i32
  }
  func.func @transform_3(%arg0: i32, %arg1: i32) -> (i32, i32) {
    %c0_i32 = arith.constant 0 : i32
    %c0_i32_0 = arith.constant 0 : i32
    %c0_i32_1 = arith.constant 0 : i32
    return %c0_i32, %c0_i32_0 : i32, i32
  }
  func.func @transform_4(%arg0: i32, %arg1: i32) -> (i32, i32) {
    %c0_i32 = arith.constant 0 : i32
    %c0_i32_0 = arith.constant 0 : i32
    %c0_i32_1 = arith.constant 0 : i32
    return %c0_i32, %c0_i32_0 : i32, i32
  }
  func.func @transform_5(%arg0: i32, %arg1: i32) -> (i32, i32) {
    %c0_i32 = arith.constant 0 : i32
    %c0_i32_0 = arith.constant 0 : i32
    %c0_i32_1 = arith.constant 0 : i32
    return %c0_i32, %c0_i32_0 : i32, i32
  }
  func.func @transform_6(%arg0: i32, %arg1: i32) -> (i32, i32) {
    %c0_i32 = arith.constant 0 : i32
    %c0_i32_0 = arith.constant 0 : i32
    %c0_i32_1 = arith.constant 0 : i32
    return %c0_i32, %c0_i32_0 : i32, i32
  }
  func.func @transform_7(%arg0: i32, %arg1: i32) -> (i32, i32) {
    %c0_i32 = arith.constant 0 : i32
    %c0_i32_0 = arith.constant 0 : i32
    %c0_i32_1 = arith.constant 0 : i32
    return %c0_i32, %c0_i32_0 : i32, i32
  }
  func.func @transform_8(%arg0: i32, %arg1: i32) -> (i32, i32) {
    %c0_i32 = arith.constant 0 : i32
    %c0_i32_0 = arith.constant 0 : i32
    %c0_i32_1 = arith.constant 0 : i32
    return %c0_i32, %c0_i32_0 : i32, i32
  }
  func.func @transform_9(%arg0: i32, %arg1: i32) -> (i32, i32) {
    %c0_i32 = arith.constant 0 : i32
    %c0_i32_0 = arith.constant 0 : i32
    %c0_i32_1 = arith.constant 0 : i32
    return %c0_i32, %c0_i32_0 : i32, i32
  }
  func.func @transform_10(%arg0: i32, %arg1: i32) -> (i32, i32) {
    %c0_i32 = arith.constant 0 : i32
    %c0_i32_0 = arith.constant 0 : i32
    %c0_i32_1 = arith.constant 0 : i32
    return %c0_i32, %c0_i32_0 : i32, i32
  }
  func.func @transform_11(%arg0: i32, %arg1: i32) -> (i32, i32) {
    %c0_i32 = arith.constant 0 : i32
    %c0_i32_0 = arith.constant 0 : i32
    %c0_i32_1 = arith.constant 0 : i32
    return %c0_i32, %c0_i32_0 : i32, i32
  }
  func.func @transform_12(%arg0: i32, %arg1: i32) -> (i32, i32) {
    %c0_i32 = arith.constant 0 : i32
    %c0_i32_0 = arith.constant 0 : i32
    %c0_i32_1 = arith.constant 0 : i32
    return %c0_i32, %c0_i32_0 : i32, i32
  }
  func.func @transform_13(%arg0: i32, %arg1: i32) -> (i32, i32, i32) {
    %c0_i32 = arith.constant 0 : i32
    %c0_i32_0 = arith.constant 0 : i32
    return %arg0, %arg1, %c0_i32 : i32, i32, i32
  }
  func.func @transform_14(%arg0: i32, %arg1: i32) -> (i32, i32, i32, i32) {
    %c0_i32 = arith.constant 0 : i32
    %c0_i32_0 = arith.constant 0 : i32
    %c0_i32_1 = arith.constant 0 : i32
    return %arg0, %c0_i32, %arg1, %c0_i32_0 : i32, i32, i32, i32
  }
}

</mosaic_0001>

<bundles_post_ra>
// kernel: tpu_custom_call.1
= control target key start
LH: loop header
LB: loop body
LE: loop exit
PB: predicated region body
PF: predicated region fallthrough
CT: control target
= control target key end

     0   :  { %s2653_s0 = inlined_call_operand.vmem [shape: f32[2,8,32], index: 0, kind: input, shape index: {}]   ;;  %s2654_s1 = inlined_call_operand.vmem [shape: f32[1,32], index: 1, kind: input, shape index: {}]   ;;  %s2655_s2 = inlined_call_operand.vmem [shape: f32[1,32], index: 2, kind: input, shape index: {}]   ;;  %s2656_s3 = inlined_call_operand.vmem [shape: bf16[32,96], index: 3, kind: input, shape index: {}]   ;;  %s2657_s4 = inlined_call_operand.hbm [shape: f32[1,96], index: 4, kind: input, shape index: {}]   ;;  %s2658_s5 = inlined_call_operand.vmem [shape: bf16[32,32], index: 5, kind: input, shape index: {}]   ;;  %s2659_s6 = inlined_call_operand.hbm [shape: f32[1,32], index: 6, kind: input, shape index: {}]   ;;  %s2660_s7 = inlined_call_operand.hbm [shape: f32[1,32], index: 7, kind: input, shape index: {}]   ;;  %s2661_s8 = inlined_call_operand.hbm [shape: f32[1,32], index: 8, kind: input, shape index: {}]   ;;  %s2662_s9 = inlined_call_operand.vmem [shape: bf16[32,64], index: 9, kind: input, shape index: {}]   ;;  %s2663_s10 = inlined_call_operand.vmem [shape: f32[1,64], index: 10, kind: input, shape index: {}]   ;;  %s2664_s11 = inlined_call_operand.vmem [shape: bf16[64,32], index: 11, kind: input, shape index: {}]   ;;  %s2665_s12 = inlined_call_operand.vmem [shape: f32[1,32], index: 12, kind: input, shape index: {}]   ;;  %s2666_s13 = inlined_call_operand.hbm [shape: f32[2,8,32], index: 13, kind: output, shape index: {0}]   ;;  %s2667_s14 = inlined_call_operand.hbm [shape: f32[2,4,8,8], index: 14, kind: output, shape index: {1}]  }
   0x1   :  { %2681 = sst [smem:[#allocation27_spill]] %s2659_s6 }
   0x2   :  { %2682 = sst [smem:[#allocation28_spill]] %s2665_s12 }
   0x3   :  { %2683 = sst [smem:[#allocation29_spill]] %s2666_s13 }
   0x4   :  { %2684 = sst [smem:[#allocation30_spill]] %s2667_s14 }
   0x5   :  { %20 = vsyncpa [#allocation5], 0 }
   0x6   :  { %21 = vsyncpa [#allocation8], 0 }
   0x7   :  { %22 = vsyncpa [#allocation11], 0 }
   0x8   :  { %23 = vsyncpa [#allocation6], 0 }
   0x9   :  { %25 = vsyncpa [#allocation6 + $0x1], 0 }
   0xa   :  { %26 = vsyncpa [#allocation14], 0 }
   0xb   :  { %28 = vsyncpa [#allocation14 + $0x1], 0  ;;  %s2238_s29 = smov 0   ;;  %s2240_s30 = smov 0  }
   0xc   :  { %s2242_s15 = smov 0   ;;  %s2244_s16 = smov 0  }
   0xd   :  { %s2246_s17 = smov 0   ;;  %s2248_s18 = smov 0  }
   0xe LB: > { %2685 = sst [smem:[#allocation20_spill]] %s2118_s29  ;;  %s1579_s19 = sadd.s32 4294967295, %s2138_s18   ;;  %s2138_s18 = sphi %s2248_s18, %s34_s18   ;;  %s2134_s17 = sphi %s2246_s17, %s2712_s17   ;;  %s2130_s16 = sphi %s2244_s16, %s2711_s16   ;;  %s2126_s15 = sphi %s2242_s15, %s2710_s15   ;;  %s2122_s30 = sphi %s2240_s30, %s2714_s30   ;;  %s2118_s29 = sphi %s2238_s29, %s2713_s29  }
   0xf   : > { %2686 = sst [smem:[#allocation21_spill]] %s2126_s15  ;;  %s1580_s20 = sadd.s32 4294967294, %s2138_s18  }
  0x10   : > { %2687 = sst [smem:[#allocation22_spill]] %s2134_s17  ;;  %s46_s21 = sadd.s32 1, %s2134_s17 }
  0x11   : > { %2688 = sst [smem:[#allocation23_spill]] %s2138_s18  ;;  %s333_s22 = sadd.s32 1, %s2126_s15 }
  0x12   : > { %p48_p0 = scmp.ge.s32.totalorder %s46_s21, 2  ;;  %p343_p1 = scmp.ne.s32.totalorder %s2126_s15, %s2122_s30 }
  0x13   : > { %p344_p2 = scmp.eq.s32.totalorder %s1579_s19, 1  ;;  %p349_p3 = scmp.ne.s32.totalorder %s2122_s30, %s2118_s29 }
  0x14   : > { %s2716_s21 = smov (%p48_p0, %s46_s21), 0  ;;  %p350_p5 = scmp.eq.s32.totalorder %s1580_s20, 1 }
  0x15   : > { %2689 = sst [smem:[#allocation24_spill]] %s2716_s21  ;;  %p2278_p4 = por %p344_p2, %p343_p1 }
  0x16   : > { %s328_s24 = ssub.s32 %s2134_s17, %s2716_s21  ;;  %p1581_p6 = scmp.ge.s32.totalorder %s2138_s18, 1 }
  0x17   : > { %s2690_s23 = scalar_select %p2278_p4, 1, 0 }
  0x18   : > { %p331_p7 = scmp.eq.s32.totalorder %s328_s24, 0  ;;  %p2285_p8 = por %p350_p5, %p349_p3 }
  0x19   : > { %p385_p9 = scmp.lt.s32.totalorder %s2138_s18, 3  ;;  %p2297_p11 = scmp.eq.s32.totalorder %s1579_s19, 0 }
  0x1a   : > { %s2691_s25 = scalar_select %p2285_p8, 1, 0 }
  0x1b   : > { %s2291_s26 = scalar_select %p331_p7, %s2126_s15, %s333_s22  }
  0x1c   : > { %2692 = sst [smem:[#allocation25_spill]] %s2691_s25  ;;  %p2293_p10 = pnand %p1581_p6, %p385_p9 }
  0x1d   : > { %2693 = sst [smem:[#allocation26_spill]] %s2291_s26  ;;  %s2140_s20 = smov [#allocation7]  }
  0x1e   : > { %s2694_s27 = scalar_select %p2293_p10, 1, 0 }
  0x1f   : > { %s2695_s28 = scalar_select %p2297_p11, 1, 0 }
  0x20   : > { %p1772_p12 = pneg %p2293_p10  ;;  %s421_s24 = sshll.u32 %s2140_s20, 4  ;;  %s422_s24 = int_to_ptr.vmem [resolvable:$true] %s421_s24 }
  0x21   : > { %s2141_s22 = smov [#allocation4]   ;;  %s2697_s6 = sld [smem:[#allocation27_spill]] }
  0x22   : > { %p2305_p13 = pnand %p2297_p11, %p1772_p12  ;;  %s407_s17 = sshll.u32 %s2141_s22, 4  ;;  %s2309_s17 = int_to_ptr.vmem [resolvable:$true] %s407_s17 }
  0x24   : > { %p2319_p1 = pneg %p2305_p13 }
  0x27   : > { %s1904_s15 = scalar_lea.hbm %s2697_s6, 16 }
  0x28   : > { %p1905_p0 = scmp.ne.s32.totalorder %s2697_s6, %s1904_s15  ;;  %p1911_p5 = scmp.lt.u32.totalorder %s1904_s15, %s2697_s6 }
  0x2a   : > { %p1907_p2 = pnand %p2319_p1, %p1905_p0 }
  0x2c   : > { %p1908_p3 = pneg %p1907_p2 }
  0x2e   : > { %p1913_p6 = pnand %p1911_p5, %p1908_p3 }
  0x30   : > { %1916 = shalt.err (!%p1913_p6)
}
  0x31   : > { %s1917_s26 = scalar_lea.vmem %s422_s24, 16  ;;  %s1924_s29 = scalar_lea.vmem %s422_s24, 32 }
  0x32   : > { %p1918_p7 = scmp.ne.s32.totalorder %s422_s24, %s1917_s26  ;;  %p1925_p8 = scmp.lt.s32.totalorder %s422_s24, %s422_s24 }
  0x33   : > { %p1926_p4 = scmp.lt.s32.totalorder %s1924_s29, %s1917_s26 }
  0x34   : > { %p1920_p9 = pnand %p1918_p7, %p2319_p1 }
  0x35   : > { %p1927_p11 = por %p1926_p4, %p1925_p8 }
  0x36   : > { %p1921_p12 = pneg %p1920_p9 }
  0x38   : > { %p1928_p10 = pnand %p1927_p11, %p1921_p12 }
  0x3a   : > { %1931 = shalt.err (!%p1928_p10)
}
  0x3b   : > { %1778 = dma.hbm_to_vmem [thread:$0]  (!%p2305_p13), %s2697_s6, 16, %s422_s24, [#allocation8]  }
  0x3c   : > { %s1932_s22 = scalar_lea.hbm %s2657_s4, 16 }
  0x3d   : > { %p1933_p0 = scmp.ne.s32.totalorder %s2657_s4, %s1932_s22  ;;  %p1939_p8 = scmp.lt.u32.totalorder %s1932_s22, %s2657_s4 }
  0x3f   : > { %p1935_p2 = pnand %p1933_p0, %p2319_p1 }
  0x41   : > { %p1936_p4 = pneg %p1935_p2 }
  0x43   : > { %p1941_p10 = pnand %p1939_p8, %p1936_p4 }
  0x45   : > { %1944 = shalt.err (!%p1941_p10)
}
  0x46   : > { %s1945_s24 = scalar_lea.vmem %s2309_s17, 16  ;;  %s1952_s12 = scalar_lea.vmem %s2309_s17, 32 }
  0x47   : > { %p1946_p11 = scmp.ne.s32.totalorder %s2309_s17, %s1945_s24  ;;  %p1953_p6 = scmp.lt.s32.totalorder %s2309_s17, %s2309_s17 }
  0x48   : > { %p1954_p7 = scmp.lt.s32.totalorder %s1952_s12, %s1945_s24 }
  0x49   : > { %p1948_p3 = pnand %p1946_p11, %p2319_p1 }
  0x4a   : > { %p1955_p9 = por %p1954_p7, %p1953_p6 }
  0x4b   : > { %p1949_p5 = pneg %p1948_p3 }
  0x4d   : > { %p1956_p12 = pnand %p1955_p9, %p1949_p5 }
  0x4f   : > { %1959 = shalt.err (!%p1956_p12)
}
  0x50   : > { %1775 = dma.hbm_to_vmem [thread:$0]  (!%p2305_p13), %s2657_s4, 16, %s2309_s17, [#allocation5]  }
  0x51   : > { %s2142_s19 = smov [#allocation9]   ;;  %s2143_s18 = smov [#allocation10]  }
  0x52   : > { %s432_s15 = sshll.u32 %s2142_s19, 4  ;;  %s443_s22 = sshll.u32 %s2143_s18, 4  ;;  %s433_s15 = int_to_ptr.vmem [resolvable:$true] %s432_s15  ;;  %s444_s22 = int_to_ptr.vmem [resolvable:$true] %s443_s22 }
  0x53   : > { %s1960_s24 = scalar_lea.hbm %s2660_s7, 16 }
  0x54   : > { %p1961_p0 = scmp.ne.s32.totalorder %s2660_s7, %s1960_s24  ;;  %p1967_p8 = scmp.lt.u32.totalorder %s1960_s24, %s2660_s7 }
  0x56   : > { %p1963_p2 = pnand %p1961_p0, %p2319_p1 }
  0x58   : > { %p1964_p4 = pneg %p1963_p2 }
  0x5a   : > { %p1969_p10 = pnand %p1967_p8, %p1964_p4 }
  0x5c   : > { %1972 = shalt.err (!%p1969_p10)
}
  0x5d   : > { %s1973_s17 = scalar_lea.vmem %s433_s15, 16  ;;  %s1980_s25 = scalar_lea.vmem %s433_s15, 32 }
  0x5e   : > { %p1974_p11 = scmp.ne.s32.totalorder %s433_s15, %s1973_s17  ;;  %p1981_p6 = scmp.lt.s32.totalorder %s433_s15, %s433_s15 }
  0x5f   : > { %p1982_p7 = scmp.lt.s32.totalorder %s1980_s25, %s1973_s17 }
  0x60   : > { %p1976_p3 = pnand %p1974_p11, %p2319_p1 }
  0x61   : > { %p1983_p9 = por %p1982_p7, %p1981_p6 }
  0x62   : > { %p1977_p5 = pneg %p1976_p3 }
  0x64   : > { %p1984_p12 = pnand %p1983_p9, %p1977_p5 }
  0x66   : > { %1987 = shalt.err (!%p1984_p12)
}
  0x67   : > { %1781 = dma.hbm_to_vmem [thread:$0]  (!%p2305_p13), %s2660_s7, 16, %s433_s15, [#allocation8]  }
  0x68   : > { %s1988_s26 = scalar_lea.hbm %s2661_s8, 16 }
  0x69   : > { %p1989_p0 = scmp.ne.s32.totalorder %s2661_s8, %s1988_s26  ;;  %p1995_p8 = scmp.lt.u32.totalorder %s1988_s26, %s2661_s8 }
  0x6b   : > { %p1991_p2 = pnand %p1989_p0, %p2319_p1 }
  0x6d   : > { %p1992_p4 = pneg %p1991_p2 }
  0x6f   : > { %p1997_p10 = pnand %p1995_p8, %p1992_p4 }
  0x71   : > { %2000 = shalt.err (!%p1997_p10)
}
  0x72   : > { %s2001_s17 = scalar_lea.vmem %s444_s22, 16  ;;  %s2008_s15 = scalar_lea.vmem %s444_s22, 32 }
  0x73   : > { %p2002_p11 = scmp.ne.s32.totalorder %s444_s22, %s2001_s17  ;;  %p2009_p6 = scmp.lt.s32.totalorder %s444_s22, %s444_s22 }
  0x74   : > { %p2010_p7 = scmp.lt.s32.totalorder %s2008_s15, %s2001_s17 }
  0x75   : > { %p2004_p3 = pnand %p2002_p11, %p2319_p1 }
  0x76   : > { %p2011_p9 = por %p2010_p7, %p2009_p6 }
  0x77   : > { %p2005_p5 = pneg %p2004_p3 }
  0x79   : > { %p2012_p12 = pnand %p2011_p9, %p2005_p5 }
  0x7b   : > { %2015 = shalt.err (!%p2012_p12)
}
  0x7c   : > { %1784 = dma.hbm_to_vmem [thread:$0]  (!%p2305_p13), %s2661_s8, 16, %s444_s22, [#allocation11]  }
  0x7d   : > { %p2699_p0 = scmp.ne.s32.totalorder %s2694_s27, 0 }
  0x7e   : > { %p2700_p2 = scmp.ne.s32.totalorder (!%p2699_p0), %s2695_s28, 0 }
  0x7f   : > { %475 = sbr.rel (%p2699_p0) target bundleno = 2738 (0xab2), region = 72 }
  0x86   : > { %2097 = dma.done.wait (%p2700_p2), [#allocation5], 16  }
  0x87   : > { %2099 = vsyncadd (%p2700_p2), [#allocation5], 4294967280 }
  0x88   : > { %2101 = dma.done.wait (%p2700_p2), [#allocation8], 32  }
  0x89   : > { %2103 = vsyncadd (%p2700_p2), [#allocation8], 4294967264 }
  0x8a   : > { %2105 = dma.done.wait (%p2700_p2), [#allocation11], 16  }
  0x8b   : > { %2107 = vsyncadd (%p2700_p2), [#allocation11], 4294967280  ;;  %p537_p13 = scmp.lt.s32.totalorder %s2130_s16, 1  ;;  %vm549_vm0 = vcmask 261120   ;;  %v1870_v7 = vld [vmem:[%s2656_s3] sm:$0xff]   ;;  %v2144_v8 = vmov 0.0  }
  0x8c   : > { %1668 = vmatprep.subr.bf16.mxu0 %v2144_v8  ;;  %vm2145_vm1 = vmmov 0   ;;  %v1871_v9 = vld [vmem:[%s2656_s3 + $0x8] sm:$0xff]   ;;  %1676 = vmatprep.subr.bf16.mxu1 %v2144_v8  ;;  %v1595_v14 = vld [vmem:[%s2654_s1] ss:$0 sm:$0xff]  ;;  %vm646_vm2 = vcmask 781312   ;;  %s2146_s17 = smov 96  }
  0x8d   : > { %s538_s21 = scalar_select %p537_p13, %s2130_s16, 1  ;;  %1672 = vmatprep.mubr.msk.bf16.mxu0 %vm2145_vm1, %v2144_v8  ;;  %1669 = vmatpush3.bf16.msra.mxu0 %v1870_v7  ;;  %v1596_v16 = vld [vmem:[%s2655_s2] ss:$0 sm:$0xff]  ;;  %v1597_v20 = vld [vmem:[#allocation4] ss:$0 sm:$0xff]  ;;  %vm662_vm3 = vcmask 64512  }
  0x8e   : > { %1670 = vmatprep.subr.bf16.mxu0 %v2144_v8  ;;  %1678 = vmatprep.mubr.msk.bf16.mxu1 %vm2145_vm1, %v2144_v8  ;;  %s2147_s15 = smov 120   ;;  %s2148_s25 = smov 88   ;;  %vm728_vm4 = vcmask 1043456   ;;  %vm893_vm5 = vcmask 130112   ;;  %vm1012_vm6 = vcmask 195712   ;;  %vm1131_vm7 = vcmask 261312  }
  0x8f   : > { %s1594_s27 = sshll.u32 %s538_s21, 3  ;;  %s2149_s6 = smov 80   ;;  %vm1349_vm8 = vcmask 523264  }
  0x90   : > { %s540_s19 = scalar_lea.vmem %s2653_s0, %s1594_s27  ;;  %s2150_s21 = smov 112  }
  0x91   : > { %v2414_v0 = vld [vmem:[%s540_s19] sm:$0xff]  ;;  %1671 = vmatpush3.bf16.msra.mxu0 %v1871_v9  ;;  %s2151_s27 = smov 72   ;;  %s2152_s20 = smov 104  }
  0x92   : > { %v550_v1 = vsel %vm549_vm0, %v2414_v0, 0.0  ;;  %1682 = vmatprep.subr.bf16.mxu0 %v2144_v8  ;;  %s2153_s22 = smov 64   ;;  %s2154_s19 = smov 56  }
  0x93   : > { %551 = vadd.xlane.f32.xlu0 %v550_v1  ;;  %s2155_s28 = smov 48   ;;  %s2156_s14 = smov 40  }
  0x94   : > { %s2483_s18 = sand.u32 1, %s2122_s30   ;;  %s2157_s24 = smov 8  }
  0x95   : > { %s1593_s26 = sshll.u32 %s2483_s18, 5  ;;  %p2702_p4 = scmp.ne.s32.totalorder %s2690_s23, 0 }
  0x96   : > { %s2487_s29 = scalar_lea.vmem [#allocation13], %s1593_s26  ;;  %s2160_s12 = smov [#allocation13]  }
  0x97   : > { %s2020_s13 = sshll.u32 %s2160_s12, 4  ;;  %s2021_s13 = int_to_ptr.vmem [resolvable:$false] %s2020_s13 }
 0x120   : > { %v552_v2 = vpop.xlane.xlu0 %551 }
 0x121   : > { %v554_v3 = vmul.f32 0.03125, %v552_v2 }
 0x123   : > { %v555_v4 = vsub.f32 %v2414_v0, %v554_v3 }
 0x125   : > { %v556_v5 = vmul.f32 %v555_v4, %v555_v4 }
 0x127   : > { %v557_v6 = vsel %vm549_vm0, %v556_v5, 0.0 }
 0x128   : > { %558 = vadd.xlane.f32.xlu0 %v557_v6 }
 0x1b5   : > { %v559_v10 = vpop.xlane.xlu0 %558 }
 0x1b6   : > { %v560_v11 = vmul.f32 0.03125, %v559_v10 }
 0x1b8   : > { %v561_v12 = vadd.f32 1e-05, %v560_v11 }
 0x1ba   : > { %1882 = vrsqrt.f32 %v561_v12 }
 0x1c4   : > { %v1883_v13 = vpop.eup %1882 }
 0x1c5   : > { %v563_v15 = vmul.f32 %v1883_v13, %v555_v4 }
 0x1c7   : > { %v570_v17 = vmul.f32 %v1595_v14, %v563_v15 }
 0x1c9   : > { %v577_v18 = vadd.f32 %v1596_v16, %v570_v17 }
 0x1cb   : > { %v578_v19 = vpack.c.bf16 %v577_v18, %v577_v18 }
 0x1cd   : > { %1673 = vmatmul.mubr.msk.bf16.vlgmr.msra.gmra.mrb[0].mxu0 %vm549_vm0, %v578_v19 }
 0x1ce   : > { %1684 = vmatprep.mubr.msk.bf16.mxu0 %vm2145_vm1, %v2144_v8 }
 0x2a0   : > { %v639_v21 = vpop.f32.mrb[0].mxu0 }
 0x2a1   : > { %v640_v22 = vadd.f32 %v1597_v20, %v639_v21  ;;  %v1674_v23 = vpop.f32.mrb[1].mxu0 }
 0x2a2   : > { %v642_v24 = vpop.f32.mrb[2].mxu0 }
 0x2a3   : > { %v645_v25 = vpack.c.bf16 %v640_v22, %v640_v22  ;;  %v1675_v26 = vpop.f32.mrb[3].mxu0 }
 0x2a5   : > { %647 = vst.msk [vmem:[#allocation2] sm:$0xf] %vm646_vm2, %v645_v25 }
 0x2ac   : > { %v2443_v27 = vld [vmem:[#allocation2] ss:$0 sps:$4 sm:$0xff]  }
 0x2ad   : > { %v655_v28 = vld [vmem:[#allocation2] sm:$0xf]  ;;  %660 = vrot.lane.b32.xlu1 %v2443_v27, %s2146_s17 }
 0x2ae   : > { %v1604_v29 = vcombine.low %v655_v28, %v655_v28 }
 0x2b0   : > { %776 = vrot.lane.b32.xlu0 %v1604_v29, %s2147_s15 }
 0x2b1   : > { %778 = vrot.lane.b32.xlu1 %v2443_v27, %s2148_s25  ;;  %s2158_s25 = smov 16  }
 0x2b5   : > { %897 = vrot.lane.b32.xlu1 %v2443_v27, %s2149_s6  ;;  %s2159_s6 = smov 24  }
 0x2b9   : > { %895 = vrot.lane.b32.xlu1 %v1604_v29, %s2150_s21  ;;  %s1429_s21 = sshll.u32 %s2487_s29, 4  ;;  %s2563_s21 = int_to_ptr.vmem [resolvable:$true] %s1429_s21 }
 0x2ba   : > { %s2016_s26 = scalar_lea.vmem %s2563_s21, 512  ;;  %p2023_p11 = scmp.lt.s32.totalorder %s2563_s21, %s2021_s13 }
 0x2bb   : > { %p2017_p1 = scmp.ne.s32.totalorder %s2563_s21, %s2016_s26 }
 0x2bd   : > { %1016 = vrot.lane.b32.xlu1 %v2443_v27, %s2151_s27  ;;  %s1637_s27 = sshll.u32 %s2130_s16, 9  ;;  %p2018_p8 = pnand %p2017_p1, %p2702_p4 }
 0x2bf   : > { %p2019_p10 = pneg %p2018_p8 }
 0x2c1   : > { %1014 = vrot.lane.b32.xlu1 %v1604_v29, %s2152_s20 }
 0x31f   : > { %v661_v30 = vpop.permute.xlu1 %660 }
 0x320   : > { %v667_v31 = vsel %vm662_vm3, %v661_v30, 0 }
 0x321   : > { %1677 = vmatpush3.bf16.xpose.msra.mxu1 %v667_v31 }
 0x322   : > { %1688 = vmatprep.subr.bf16.mxu1 %v2144_v8  ;;  %v777_v35 = vpop.permute.xlu0 %776 }
 0x323   : > { %v779_v32 = vpop.permute.xlu1 %778 }
 0x324   : > { %v784_v33 = vsel %vm662_vm3, %v779_v32, 0 }
 0x327   : > { %v898_v34 = vpop.permute.xlu1 %897 }
 0x328   : > { %1679 = vmatmul.mubr.msk.bf16.vlgmr.msra.gmra.mrb[0].mxu1 %vm662_vm3, %v655_v28  ;;  %v903_v37 = vsel %vm662_vm3, %v898_v34, 0 }
 0x329   : > { %1689 = vmatpush3.bf16.xpose.msra.mxu1 %v784_v33  ;;  %1690 = vmatprep.mubr.msk.bf16.mxu1 %vm2145_vm1, %v2144_v8 }
 0x32a   : > { %1700 = vmatprep.subr.bf16.mxu1 %v2144_v8 }
 0x32b   : > { %v896_v36 = vpop.permute.xlu1 %895 }
 0x32f   : > { %v1017_v38 = vpop.permute.xlu1 %1016 }
 0x330   : > { %1691 = vmatmul.mubr.msk.bf16.vlgmr.msra.gmra.mrb[4].mxu1 %vm662_vm3, %v777_v35  ;;  %v1022_v39 = vsel %vm662_vm3, %v1017_v38, 0 }
 0x331   : > { %1701 = vmatpush3.bf16.xpose.msra.mxu1 %v903_v37  ;;  %1702 = vmatprep.mubr.msk.bf16.mxu1 %vm2145_vm1, %v2144_v8 }
 0x332   : > { %1712 = vmatprep.subr.bf16.mxu1 %v2144_v8 }
 0x333   : > { %v1015_v40 = vpop.permute.xlu1 %1014 }
 0x338   : > { %1703 = vmatmul.mubr.msk.bf16.vlgmr.msra.gmra.mrb[8].mxu1 %vm662_vm3, %v896_v36 }
 0x339   : > { %1713 = vmatpush3.bf16.xpose.msra.mxu1 %v1022_v39  ;;  %1714 = vmatprep.mubr.msk.bf16.mxu1 %vm2145_vm1, %v2144_v8 }
 0x33a   : > { %1724 = vmatprep.subr.bf16.mxu1 %v2144_v8 }
 0x340   : > { %1715 = vmatmul.mubr.msk.bf16.vlgmr.msra.gmra.mrb[12].mxu1 %vm662_vm3, %v1015_v40 }
 0x341   : > { %1728 = vmatprep.mubr.msk.bf16.mxu1 %vm2145_vm1, %v2144_v8 }
 0x3fb   : > { %v703_v41 = vpop.f32.mrb[0].mxu1 }
 0x3fc   : > { %v709_v42 = vmul.f32 0.35355338, %v703_v41  ;;  %v1680_v43 = vpop.f32.mrb[1].mxu1 }
 0x3fd   : > { %v706_v44 = vpop.f32.mrb[2].mxu1 }
 0x3fe   : > { %v1681_v45 = vpop.f32.mrb[3].mxu1  ;;  %v710_v46 = vsel %vm662_vm3, %v709_v42, -inf }
 0x3ff   : > { %711 = vmax.xlane.f32.xlu1 %v710_v46 }
 0x403   : > { %v820_v47 = vpop.f32.mrb[4].mxu1 }
 0x404   : > { %v826_v48 = vmul.f32 0.35355338, %v820_v47  ;;  %v1692_v49 = vpop.f32.mrb[5].mxu1 }
 0x405   : > { %v823_v50 = vpop.f32.mrb[6].mxu1 }
 0x406   : > { %v1693_v51 = vpop.f32.mrb[7].mxu1  ;;  %v827_v52 = vsel %vm662_vm3, %v826_v48, -inf }
 0x407   : > { %828 = vmax.xlane.f32.xlu0 %v827_v52 }
 0x40b   : > { %v939_v53 = vpop.f32.mrb[8].mxu1 }
 0x40c   : > { %v945_v54 = vmul.f32 0.35355338, %v939_v53  ;;  %v1704_v55 = vpop.f32.mrb[9].mxu1 }
 0x40d   : > { %v942_v56 = vpop.f32.mrb[10].mxu1  ;;  %v1874_v55 = vld [vmem:[%s2658_s5] sm:$0xff]  }
 0x40e   : > { %v1705_v57 = vpop.f32.mrb[11].mxu1  ;;  %v946_v58 = vsel %vm662_vm3, %v945_v54, -inf  ;;  %1725 = vmatpush3.bf16.msra.mxu1 %v1874_v55  ;;  %v1875_v56 = vld [vmem:[%s2658_s5 + $0x8] sm:$0xff]  }
 0x40f   : > { %947 = vmax.xlane.f32.xlu1 %v946_v58  ;;  %1726 = vmatprep.subr.bf16.mxu1 %v2144_v8 }
 0x412   : > { %1727 = vmatpush3.bf16.msra.mxu1 %v1875_v56 }
 0x413   : > { %v1058_v59 = vpop.f32.mrb[12].mxu1  ;;  %1740 = vmatprep.subr.bf16.mxu1 %v2144_v8 }
 0x414   : > { %v1064_v60 = vmul.f32 0.35355338, %v1058_v59  ;;  %v1716_v61 = vpop.f32.mrb[13].mxu1 }
 0x415   : > { %v1061_v62 = vpop.f32.mrb[14].mxu1 }
 0x416   : > { %v1717_v63 = vpop.f32.mrb[15].mxu1  ;;  %v1065_v1 = vsel %vm662_vm3, %v1064_v60, -inf }
 0x417   : > { %1066 = vmax.xlane.f32.xlu0 %v1065_v1 }
 0x48c   : > { %v712_v2 = vpop.xlane.xlu1 %711 }
 0x48d   : > { %v713_v3 = vsub.f32 %v709_v42, %v712_v2 }
 0x48f   : > { %v714_v4 = vmul.f32 1.442695, %v713_v3 }
 0x491   : > { %1884 = vpow2.f32 %v714_v4 }
 0x494   : > { %v829_v5 = vpop.xlane.xlu0 %828 }
 0x495   : > { %v830_v6 = vsub.f32 %v826_v48, %v829_v5 }
 0x497   : > { %v831_v7 = vmul.f32 1.442695, %v830_v6 }
 0x499   : > { %1886 = vpow2.f32 %v831_v7  ;;  %v1614_v7 = vld [vmem:[#allocation7] ss:$0 sm:$0xff] }
 0x49b   : > { %v1885_v9 = vpop.eup %1884 }
 0x49c   : > { %v716_v10 = vsel %vm662_vm3, %v1885_v9, 0.0  ;;  %v948_v18 = vpop.xlane.xlu1 %947 }
 0x49d   : > { %717 = vadd.xlane.f32.xlu1 %v716_v10  ;;  %v949_v19 = vsub.f32 %v945_v54, %v948_v18 }
 0x49f   : > { %v950_v20 = vmul.f32 1.442695, %v949_v19 }
 0x4a3   : > { %v1887_v11 = vpop.eup %1886 }
 0x4a4   : > { %v1067_v12 = vpop.xlane.xlu0 %1066  ;;  %v833_v13 = vsel %vm662_vm3, %v1887_v11, 0.0 }
 0x4a5   : > { %v1068_v14 = vsub.f32 %v1064_v60, %v1067_v12  ;;  %834 = vadd.xlane.f32.xlu0 %v833_v13 }
 0x4a7   : > { %v1069_v15 = vmul.f32 1.442695, %v1068_v14 }
 0x4a9   : > { %1888 = vpow2.f32 %v1069_v15 }
 0x4aa   : > { %1890 = vpow2.f32 %v950_v20 }
 0x4ae   : > { %723 = vrot.lane.b32.xlu1 %v2443_v27, %s2153_s22 }
 0x4b3   : > { %v1889_v16 = vpop.eup %1888 }
 0x4b4   : > { %v1071_v17 = vsel %vm662_vm3, %v1889_v16, 0.0  ;;  %v1891_v21 = vpop.eup %1890 }
 0x4b5   : > { %1072 = vadd.xlane.f32.xlu0 %v1071_v17  ;;  %v952_v22 = vsel %vm662_vm3, %v1891_v21, 0.0 }
 0x4cb   : > { %841 = vrot.lane.b32.xlu0 %v2443_v27, %s2154_s19  ;;  %s2701_s19 = sld [smem:[#allocation30_spill]] }
 0x4d2   : > { %953 = vadd.xlane.f32.xlu1 %v952_v22 }
 0x4e3   : > { %960 = vrot.lane.b32.xlu1 %v2443_v27, %s2155_s28  ;;  %s2568_s28 = scalar_lea.hbm %s2701_s19, %s1637_s27 }
 0x4e7   : > { %1079 = vrot.lane.b32.xlu1 %v2443_v27, %s2156_s14  ;;  %s1401_s14 = scalar_lea.sflag [#allocation14], %s2483_s18 }
 0x52a   : > { %v718_v23 = vpop.xlane.xlu1 %717 }
 0x52b   : > { %1892 = vrcp.f32 %v718_v23 }
 0x52e   : > { %v724_v24 = vpop.permute.xlu1 %723 }
 0x52f   : > { %v730_v25 = vsel %vm728_vm4, %v724_v24, 0 }
 0x530   : > { %1683 = vmatpush3.bf16.msra.mxu0 %v730_v25 }
 0x531   : > { %1694 = vmatprep.subr.bf16.mxu0 %v2144_v8 }
 0x532   : > { %v835_v26 = vpop.xlane.xlu0 %834 }
 0x533   : > { %1894 = vrcp.f32 %v835_v26  ;;  %v1618_v26 = vld [vmem:[#allocation9] ss:$0 sm:$0xff] }
 0x535   : > { %v1893_v28 = vpop.eup %1892 }
 0x536   : > { %v720_v29 = vmul.f32 %v1893_v28, %v1885_v9 }
 0x538   : > { %v722_v30 = vpack.c.bf16 %v720_v29, %v720_v29  ;;  %721 = vst.msk [vmem:[%s2487_s29] sm:$0xff] %vm662_vm3, %v720_v29  ;;  %v1619_v29 = vld [vmem:[#allocation10] ss:$0 sm:$0xff] }
 0x53a   : > { %1685 = vmatmul.mubr.msk.bf16.vlgmr.msra.gmra.mrb[4].mxu0 %vm662_vm3, %v722_v30 }
 0x53b   : > { %1696 = vmatprep.mubr.msk.bf16.mxu0 %vm2145_vm1, %v2144_v8 }
 0x53d   : > { %v1895_v27 = vpop.eup %1894 }
 0x53e   : > { %v837_v31 = vmul.f32 %v1895_v27, %v1887_v11 }
 0x540   : > { %1606 = vst.msk [vmem:[%s2487_s29 + $0x8] sm:$0xff] %vm662_vm3, %v837_v31  ;;  %v840_v35 = vpack.c.bf16 %v837_v31, %v837_v31 }
 0x542   : > { %v1073_v32 = vpop.xlane.xlu0 %1072 }
 0x543   : > { %1896 = vrcp.f32 %v1073_v32  ;;  %v1878_v32 = vld [vmem:[%s2664_s11] sm:$0xff]  }
 0x546   : > { %v842_v33 = vpop.permute.xlu0 %841 }
 0x547   : > { %v847_v34 = vsel %vm728_vm4, %v842_v33, 0  ;;  %v1879_v33 = vld [vmem:[%s2664_s11 + $0x8] sm:$0xff]  }
 0x548   : > { %1695 = vmatpush3.bf16.msra.mxu0 %v847_v34  ;;  %v1880_v34 = vld [vmem:[%s2664_s11 + $0x10] sm:$0xff]  }
 0x549   : > { %1706 = vmatprep.subr.bf16.mxu0 %v2144_v8 }
 0x54b   : > { %1697 = vmatmul.mubr.msk.bf16.vlgmr.msra.gmra.mrb[8].mxu0 %vm662_vm3, %v840_v35  ;;  %v1881_v35 = vld [vmem:[%s2664_s11 + $0x18] sm:$0xff]  }
 0x54c   : > { %1708 = vmatprep.mubr.msk.bf16.mxu0 %vm2145_vm1, %v2144_v8 }
 0x54d   : > { %v1897_v36 = vpop.eup %1896 }
 0x54e   : > { %v1075_v37 = vmul.f32 %v1897_v36, %v1889_v16  ;;  %v1620_v36 = vld [vmem:[%s2663_s10] ss:$0 sm:$0xff] }
 0x550   : > { %1612 = vst.msk [vmem:[%s2487_s29 + $0x18] sm:$0xff] %vm662_vm3, %v1075_v37  ;;  %v1078_v46 = vpack.c.bf16 %v1075_v37, %v1075_v37 }
 0x55f   : > { %v954_v38 = vpop.xlane.xlu1 %953 }
 0x560   : > { %1898 = vrcp.f32 %v954_v38 }
 0x563   : > { %v961_v39 = vpop.permute.xlu1 %960 }
 0x564   : > { %v966_v40 = vsel %vm728_vm4, %v961_v39, 0 }
 0x565   : > { %1707 = vmatpush3.bf16.msra.mxu0 %v966_v40 }
 0x566   : > { %1718 = vmatprep.subr.bf16.mxu0 %v2144_v8 }
 0x567   : > { %v1080_v43 = vpop.permute.xlu1 %1079 }
 0x568   : > { %v1085_v45 = vsel %vm728_vm4, %v1080_v43, 0 }
 0x56a   : > { %v1899_v41 = vpop.eup %1898 }
 0x56b   : > { %v956_v42 = vmul.f32 %v1899_v41, %v1891_v21  ;;  %v1876_v21 = vld [vmem:[%s2662_s9] sm:$0xff]  }
 0x56d   : > { %v959_v44 = vpack.c.bf16 %v956_v42, %v956_v42  ;;  %1609 = vst.msk [vmem:[%s2487_s29 + $0x10] sm:$0xff] %vm662_vm3, %v956_v42  ;;  %s2022_s29 = scalar_lea.vmem %s2021_s13, 1024 }
 0x56e   : > { %p2024_p3 = scmp.lt.s32.totalorder %s2022_s29, %s2016_s26 }
 0x56f   : > { %1709 = vmatmul.mubr.msk.bf16.vlgmr.msra.gmra.mrb[12].mxu0 %vm662_vm3, %v959_v44 }
 0x570   : > { %1719 = vmatpush3.bf16.msra.mxu0 %v1085_v45  ;;  %1720 = vmatprep.mubr.msk.bf16.mxu0 %vm2145_vm1, %v2144_v8  ;;  %p2025_p5 = por %p2024_p3, %p2023_p11 }
 0x571   : > { %1732 = vmatprep.subr.bf16.mxu0 %v2144_v8 }
 0x572   : > { %p2026_p6 = pnand %p2025_p5, %p2019_p10 }
 0x577   : > { %1721 = vmatmul.mubr.msk.bf16.vlgmr.msra.gmra.mrb[16].mxu0 %vm662_vm3, %v1078_v46 }
 0x578   : > { %1736 = vmatprep.mubr.msk.bf16.mxu0 %vm2145_vm1, %v2144_v8  ;;  %1733 = vmatpush3.bf16.msra.mxu0 %v1876_v21 }
 0x579   : > { %1734 = vmatprep.subr.bf16.mxu0 %v2144_v8 }
 0x60d   : > { %v766_v47 = vpop.f32.mrb[4].mxu0 }
 0x60e   : > { %772 = vst.msk [vmem:[#allocation3] sm:$0xff] %vm662_vm3, %v766_v47  ;;  %v1686_v48 = vpop.f32.mrb[5].mxu0 }
 0x60f   : > { %v769_v49 = vpop.f32.mrb[6].mxu0 }
 0x610   : > { %v1687_v50 = vpop.f32.mrb[7].mxu0 }
 0x61e   : > { %v883_v51 = vpop.f32.mrb[8].mxu0 }
 0x61f   : > { %890 = vrot.lane.b32.xlu0 %v883_v51, %s2157_s24  ;;  %v1698_v52 = vpop.f32.mrb[9].mxu0 }
 0x620   : > { %v886_v53 = vpop.f32.mrb[10].mxu0 }
 0x621   : > { %v1699_v54 = vpop.f32.mrb[11].mxu0 }
 0x642   : > { %v1002_v57 = vpop.f32.mrb[12].mxu0 }
 0x643   : > { %1009 = vrot.lane.b32.xlu1 %v1002_v57, %s2158_s25  ;;  %v1710_v58 = vpop.f32.mrb[13].mxu0 }
 0x644   : > { %v1005_v59 = vpop.f32.mrb[14].mxu0 }
 0x645   : > { %v1711_v60 = vpop.f32.mrb[15].mxu0 }
 0x64a   : > { %v1121_v61 = vpop.f32.mrb[16].mxu0 }
 0x64b   : > { %1128 = vrot.lane.b32.xlu0 %v1121_v61, %s2159_s6  ;;  %v1722_v62 = vpop.f32.mrb[17].mxu0 }
 0x64c   : > { %v1124_v63 = vpop.f32.mrb[18].mxu0 }
 0x64d   : > { %v1723_v1 = vpop.f32.mrb[19].mxu0 }
 0x691   : > { %v891_v2 = vpop.permute.xlu0 %890 }
 0x692   : > { %894 = vst.msk [vmem:[#allocation3] sm:$0xff] %vm893_vm5, %v891_v2 }
 0x6b5   : > { %v1010_v3 = vpop.permute.xlu1 %1009 }
 0x6b6   : > { %1013 = vst.msk [vmem:[#allocation3] sm:$0xff] %vm1012_vm6, %v1010_v3 }
 0x6bd   : > { %v1129_v4 = vpop.permute.xlu0 %1128 }
 0x6be   : > { %1132 = vst.msk [vmem:[#allocation3] sm:$0xff] %vm1131_vm7, %v1129_v4 }
 0x6c5   : > { %v1133_v5 = vld [vmem:[#allocation3] sm:$0xff] }
 0x6c6   : > { %v1134_v6 = vpack.c.bf16 %v1133_v5, %v1133_v5 }
 0x6c8   : > { %1729 = vmatmul.mubr.msk.bf16.vlgmr.msra.gmra.mrb[16].mxu1 %vm549_vm0, %v1134_v6 }
 0x6c9   : > { %1748 = vmatprep.mubr.msk.bf16.mxu1 %vm2145_vm1, %v2144_v8  ;;  %1741 = vmatpush3.bf16.msra.mxu1 %v1878_v32 }
 0x6ca   : > { %1742 = vmatprep.subr.bf16.mxu1 %v2144_v8 }
 0x6cd   : > { %1743 = vmatpush3.bf16.msra.mxu1 %v1879_v33 }
 0x6ce   : > { %1744 = vmatprep.subr.bf16.mxu1 %v2144_v8 }
 0x6d1   : > { %1745 = vmatpush3.bf16.msra.mxu1 %v1880_v34 }
 0x6d2   : > { %1746 = vmatprep.subr.bf16.mxu1 %v2144_v8 }
 0x6d5   : > { %1747 = vmatpush3.bf16.msra.mxu1 %v1881_v35 }
 0x79b   : > { %v1196_v9 = vpop.f32.mrb[16].mxu1 }
 0x79c   : > { %v1197_v10 = vadd.f32 %v1614_v7, %v1196_v9  ;;  %v1730_v11 = vpop.f32.mrb[17].mxu1 }
 0x79d   : > { %v1199_v12 = vpop.f32.mrb[18].mxu1 }
 0x79e   : > { %v2529_v13 = vadd.f32 %v1197_v10, %v2414_v0  ;;  %v1731_v14 = vpop.f32.mrb[19].mxu1  ;;  %v1877_v0 = vld [vmem:[%s2662_s9 + $0x8] sm:$0xff]  }
 0x79f   : > { %1735 = vmatpush3.bf16.msra.mxu0 %v1877_v0 }
 0x7a0   : > { %v1205_v15 = vsel %vm549_vm0, %v2529_v13, 0.0 }
 0x7a1   : > { %1206 = vadd.xlane.f32.xlu1 %v1205_v15 }
 0x82e   : > { %v1207_v16 = vpop.xlane.xlu1 %1206 }
 0x82f   : > { %v1209_v17 = vmul.f32 0.03125, %v1207_v16 }
 0x831   : > { %v1210_v18 = vsub.f32 %v2529_v13, %v1209_v17 }
 0x833   : > { %v1211_v19 = vmul.f32 %v1210_v18, %v1210_v18 }
 0x835   : > { %v1212_v20 = vsel %vm549_vm0, %v1211_v19, 0.0 }
 0x836   : > { %1213 = vadd.xlane.f32.xlu0 %v1212_v20 }
 0x8c3   : > { %v1214_v22 = vpop.xlane.xlu0 %1213 }
 0x8c4   : > { %v1215_v23 = vmul.f32 0.03125, %v1214_v22 }
 0x8c6   : > { %v1216_v24 = vadd.f32 1e-05, %v1215_v23 }
 0x8c8   : > { %1900 = vrsqrt.f32 %v1216_v24 }
 0x8d2   : > { %v1901_v25 = vpop.eup %1900 }
 0x8d3   : > { %v1218_v28 = vmul.f32 %v1901_v25, %v1210_v18 }
 0x8d5   : > { %v1225_v30 = vmul.f32 %v1618_v26, %v1218_v28 }
 0x8d7   : > { %v1232_v27 = vadd.f32 %v1619_v29, %v1225_v30 }
 0x8d9   : > { %v1233_v31 = vpack.c.bf16 %v1232_v27, %v1232_v27 }
 0x8db   : > { %1737 = vmatmul.mubr.msk.bf16.vlgmr.msra.gmra.mrb[20].mxu0 %vm549_vm0, %v1233_v31 }
 0x9ae   : > { %v1294_v37 = vpop.f32.mrb[20].mxu0 }
 0x9af   : > { %v1295_v38 = vadd.f32 %v1620_v36, %v1294_v37  ;;  %v1738_v39 = vpop.f32.mrb[21].mxu0 }
 0x9b0   : > { %v1297_v40 = vpop.f32.mrb[22].mxu0 }
 0x9b1   : > { %v1301_v41 = vmul.f32 0.044715, %v1295_v38  ;;  %v1739_v42 = vpop.f32.mrb[23].mxu0  ;;  %v1300_v47 = vmul.f32 0.5, %v1295_v38 }
 0x9b3   : > { %v1302_v43 = vmul.f32 %v1301_v41, %v1295_v38 }
 0x9b5   : > { %v1303_v44 = vmul.f32 %v1302_v43, %v1295_v38 }
 0x9b7   : > { %v1304_v45 = vadd.f32 %v1303_v44, %v1295_v38 }
 0x9b9   : > { %v1305_v46 = vmul.f32 0.7978846, %v1304_v45 }
 0x9bb   : > { %1902 = vtanh.f32 %v1305_v46 }
 0x9c5   : > { %v1903_v8 = vpop.eup %1902 }
 0x9c6   : > { %v1307_v48 = vadd.f32 1.0, %v1903_v8 }
 0x9c8   : > { %v1308_v49 = vmul.f32 %v1307_v48, %v1300_v47 }
 0x9ca   : > { %v1309_v50 = vpack.c.bf16 %v1308_v49, %v1308_v49 }
 0x9cc   : > { %1749 = vmatmul.mubr.msk.bf16.vlgmr.msra.gmra.mrb[20].mxu1 %vm1349_vm8, %v1309_v50 }
 0x9cd   : > { %2029 = shalt.err (!%p2026_p6)
}
 0x9ce   : > { %s2030_s17 = scalar_lea.hbm %s2568_s28, 512  ;;  %s2034_s6 = scalar_lea.hbm %s2701_s19, 1024 }
 0x9cf   : > { %p2031_p7 = scmp.ne.s32.totalorder %s2568_s28, %s2030_s17  ;;  %p2035_p0 = scmp.lt.u32.totalorder %s2568_s28, %s2701_s19 }
 0x9d0   : > { %p2036_p2 = scmp.lt.u32.totalorder %s2034_s6, %s2030_s17  ;;  %p2038_p1 = scmp.lt.u32.totalorder %s2030_s17, %s2568_s28 }
 0x9d1   : > { %p2032_p9 = pnand %p2031_p7, %p2702_p4 }
 0x9d2   : > { %p2037_p13 = por %p2036_p2, %p2035_p0 }
 0x9d3   : > { %p2033_p12 = pneg %p2032_p9 }
 0x9d4   : > { %p2039_p8 = por %p2038_p1, %p2037_p13 }
 0x9d6   : > { %p2040_p10 = pnand %p2039_p8, %p2033_p12 }
 0x9d8   : > { %2043 = shalt.err (!%p2040_p10)
}
 0x9d9   : > { %s2161_s22 = smov 128   ;;  %s1592_s26 = sshll.u32 %s2483_s18, 3 }
 0x9da   : > { %1769 = dma.vmem_to_hbm [thread:$0]  (%p2702_p4), %s2563_s21, 512, %s2568_s28, %s1401_s14, %s2161_s22, %s2161_s22, %s2157_s24  }
 0x9db   : > { %s2703_s29 = sld [smem:[#allocation28_spill]]  ;;  %s1632_s17 = sshll.u32 %s2130_s16, 7 }
 0x9dc   : > { %s529_s15 = scalar_lea.vmem [#allocation12], %s1592_s26  ;;  %s2704_s20 = sld [smem:[#allocation29_spill]] }
 0x9dd   : > { %s1415_s25 = sshll.u32 %s529_s15, 4  ;;  %s1396_s16 = scalar_lea.sflag [#allocation6], %s2483_s18  ;;  %s2606_s25 = int_to_ptr.vmem [resolvable:$true] %s1415_s25 }
 0x9de   : > { %s2044_s21 = scalar_lea.vmem %s2606_s25, 128  ;;  %s2162_s28 = smov [#allocation12]  }
 0x9df   : > { %p2045_p11 = scmp.ne.s32.totalorder %s2606_s25, %s2044_s21  ;;  %s2048_s14 = sshll.u32 %s2162_s28, 4  ;;  %s2049_s14 = int_to_ptr.vmem [resolvable:$false] %s2048_s14 }
 0x9e0   : > { %s2050_s22 = scalar_lea.vmem %s2049_s14, 256  ;;  %p2051_p6 = scmp.lt.s32.totalorder %s2606_s25, %s2049_s14 }
 0x9e1   : > { %v1624_v51 = vld [vmem:[%s2703_s29] ss:$0 sm:$0xff]  ;;  %p2046_p3 = pnand %p2045_p11, %p2702_p4  ;;  %p2052_p7 = scmp.lt.s32.totalorder %s2050_s22, %s2044_s21 }
 0x9e2   : > { %s2604_s24 = scalar_lea.hbm %s2704_s20, %s1632_s17 }
 0x9e3   : > { %p2047_p5 = pneg %p2046_p3  ;;  %p2053_p9 = por %p2052_p7, %p2051_p6 }
 0x9e5   : > { %p2054_p12 = pnand %p2053_p9, %p2047_p5 }
 0xa9f   : > { %v1387_v52 = vpop.f32.mrb[20].mxu1 }
 0xaa0   : > { %v1388_v53 = vadd.f32 %v1624_v51, %v1387_v52  ;;  %v1750_v54 = vpop.f32.mrb[21].mxu1 }
 0xaa1   : > { %v1390_v55 = vpop.f32.mrb[22].mxu1 }
 0xaa2   : > { %v1393_v56 = vadd.f32 %v1388_v53, %v2529_v13  ;;  %v1751_v57 = vpop.f32.mrb[23].mxu1 }
 0xaa4   : > { %1394 = vst.msk [vmem:[%s529_s15] sm:$0xff] %vm549_vm0, %v1393_v56 }
 0xaa5   : > { %2057 = shalt.err (!%p2054_p12)
}
 0xaa6   : > { %s2058_s18 = scalar_lea.hbm %s2604_s24, 128  ;;  %s2062_s13 = scalar_lea.hbm %s2704_s20, 256 }
 0xaa7   : > { %p2059_p0 = scmp.ne.s32.totalorder %s2604_s24, %s2058_s18  ;;  %p2063_p1 = scmp.lt.u32.totalorder %s2604_s24, %s2704_s20 }
 0xaa8   : > { %p2064_p8 = scmp.lt.u32.totalorder %s2062_s13, %s2058_s18  ;;  %p2066_p11 = scmp.lt.u32.totalorder %s2058_s18, %s2604_s24 }
 0xaa9   : > { %p2060_p2 = pnand %p2059_p0, %p2702_p4 }
 0xaaa   : > { %p2065_p10 = por %p2064_p8, %p2063_p1 }
 0xaab   : > { %p2061_p13 = pneg %p2060_p2 }
 0xaac   : > { %p2067_p3 = por %p2066_p11, %p2065_p10 }
 0xaae   : > { %p2068_p5 = pnand %p2067_p3, %p2061_p13 }
 0xab0   : > { %2071 = shalt.err (!%p2068_p5)
}
 0xab1   : > { %1768 = dma.vmem_to_hbm [thread:$0]  (%p2702_p4), %s2606_s25, 128, %s2604_s24, %s1396_s16  }
 0xab2 PF: > { %s2705_s15 = sld [smem:[#allocation23_spill]]  ;;  %s2706_s6 = sld [smem:[#allocation20_spill]] }
 0xab3   : > { %s2707_s27 = sld [smem:[#allocation25_spill]] }
 0xab8   : > { %p1800_p6 = scmp.ge.s32.totalorder %s2705_s15, 2  ;;  %s1444_s21 = sand.u32 1, %s2706_s6  }
 0xab9   : > { %p2708_p7 = scmp.ne.s32.totalorder %s2707_s27, 0  ;;  %s1445_s28 = scalar_lea.sflag [#allocation6], %s1444_s21 }
 0xabb   : > { %p1786_p9 = pnand %p1800_p6, %p2708_p7 }
 0xabd   : > { %2109 = dma.done.wait (!%p1786_p9), %s1445_s28, 128  }
 0xabe   : > { %2111 = vsyncadd (!%p1786_p9), %s1445_s28, 4294967168  ;;  %s1454_s14 = scalar_lea.sflag [#allocation14], %s1444_s21 }
 0xabf   : > { %2113 = dma.done.wait (!%p1786_p9), %s1454_s14, 512  }
 0xac0   : > { %2115 = vsyncadd (!%p1786_p9), %s1454_s14, 4294966784  ;;  %s34_s18 = sadd.s32 1, %s2705_s15   ;;  %s2709_s23 = sld [smem:[#allocation21_spill]] }
 0xac1   : > { %p31_p12 = scmp.ge.s32.totalorder %s34_s18, 4   ;;  %s2710_s15 = sld [smem:[#allocation26_spill]] }
 0xac2   : > { %s2711_s16 = sld [smem:[#allocation22_spill]]  ;;  %s2712_s17 = sld [smem:[#allocation24_spill]] }
 0xac3   : > { %s2713_s29 = smov %s2122_s30  ;;  %33 = sbr.rel (!%p31_p12) target bundleno = 14 (0xe), region = 150 }
 0xac6   : > { %s2714_s30 = smov %s2709_s23 }
 0xaca   :  { %1459 = vsyncpa [#allocation5], 1 }
 0xacb   :  { %1461 = vsyncpa [#allocation5 + $0x1], 1 }
 0xacc   :  { %1462 = vsyncpa [#allocation8], 1 }
 0xacd   :  { %1463 = vsyncpa [#allocation11], 1 }
 0xace   :  { %1464 = vsyncpa [#allocation6], 1 }
 0xacf   :  { %1466 = vsyncpa [#allocation6 + $0x1], 1 }
 0xad0   :  { %1467 = vsyncpa [#allocation14], 1 }
 0xad1   :  { %1469 = vsyncpa [#allocation14 + $0x1], 1 }

// kernel: tpu_custom_call.1
= control target key start
LH: loop header
LB: loop body
LE: loop exit
PB: predicated region body
PF: predicated region fallthrough
CT: control target
= control target key end

     0   :  { %s2653_s0 = inlined_call_operand.vmem [shape: f32[2,8,32], index: 0, kind: input, shape index: {}]   ;;  %s2654_s1 = inlined_call_operand.vmem [shape: f32[1,32], index: 1, kind: input, shape index: {}]   ;;  %s2655_s2 = inlined_call_operand.vmem [shape: f32[1,32], index: 2, kind: input, shape index: {}]   ;;  %s2656_s3 = inlined_call_operand.vmem [shape: bf16[32,96], index: 3, kind: input, shape index: {}]   ;;  %s2657_s4 = inlined_call_operand.hbm [shape: f32[1,96], index: 4, kind: input, shape index: {}]   ;;  %s2658_s5 = inlined_call_operand.vmem [shape: bf16[32,32], index: 5, kind: input, shape index: {}]   ;;  %s2659_s6 = inlined_call_operand.hbm [shape: f32[1,32], index: 6, kind: input, shape index: {}]   ;;  %s2660_s7 = inlined_call_operand.hbm [shape: f32[1,32], index: 7, kind: input, shape index: {}]   ;;  %s2661_s8 = inlined_call_operand.hbm [shape: f32[1,32], index: 8, kind: input, shape index: {}]   ;;  %s2662_s9 = inlined_call_operand.vmem [shape: bf16[32,64], index: 9, kind: input, shape index: {}]   ;;  %s2663_s10 = inlined_call_operand.vmem [shape: f32[1,64], index: 10, kind: input, shape index: {}]   ;;  %s2664_s11 = inlined_call_operand.vmem [shape: bf16[64,32], index: 11, kind: input, shape index: {}]   ;;  %s2665_s12 = inlined_call_operand.vmem [shape: f32[1,32], index: 12, kind: input, shape index: {}]   ;;  %s2666_s13 = inlined_call_operand.hbm [shape: f32[2,8,32], index: 13, kind: output, shape index: {0}]   ;;  %s2667_s14 = inlined_call_operand.hbm [shape: f32[2,4,8,8], index: 14, kind: output, shape index: {1}]  }
   0x1   :  { %2681 = sst [smem:[#allocation27_spill]] %s2659_s6 }
   0x2   :  { %2682 = sst [smem:[#allocation28_spill]] %s2665_s12 }
   0x3   :  { %2683 = sst [smem:[#allocation29_spill]] %s2666_s13 }
   0x4   :  { %2684 = sst [smem:[#allocation30_spill]] %s2667_s14 }
   0x5   :  { %20 = vsyncpa [#allocation5], 0 }
   0x6   :  { %21 = vsyncpa [#allocation8], 0 }
   0x7   :  { %22 = vsyncpa [#allocation11], 0 }
   0x8   :  { %23 = vsyncpa [#allocation6], 0 }
   0x9   :  { %25 = vsyncpa [#allocation6 + $0x1], 0 }
   0xa   :  { %26 = vsyncpa [#allocation14], 0 }
   0xb   :  { %28 = vsyncpa [#allocation14 + $0x1], 0  ;;  %s2238_s29 = smov 0   ;;  %s2240_s30 = smov 0  }
   0xc   :  { %s2242_s15 = smov 0   ;;  %s2244_s16 = smov 0  }
   0xd   :  { %s2246_s17 = smov 0   ;;  %s2248_s18 = smov 0  }
   0xe LB: > { %2685 = sst [smem:[#allocation20_spill]] %s2118_s29  ;;  %s1579_s19 = sadd.s32 4294967295, %s2138_s18   ;;  %s2138_s18 = sphi %s2248_s18, %s34_s18   ;;  %s2134_s17 = sphi %s2246_s17, %s2712_s17   ;;  %s2130_s16 = sphi %s2244_s16, %s2711_s16   ;;  %s2126_s15 = sphi %s2242_s15, %s2710_s15   ;;  %s2122_s30 = sphi %s2240_s30, %s2714_s30   ;;  %s2118_s29 = sphi %s2238_s29, %s2713_s29  }
   0xf   : > { %2686 = sst [smem:[#allocation21_spill]] %s2126_s15  ;;  %s1580_s20 = sadd.s32 4294967294, %s2138_s18  }
  0x10   : > { %2687 = sst [smem:[#allocation22_spill]] %s2134_s17  ;;  %s46_s21 = sadd.s32 1, %s2134_s17 }
  0x11   : > { %2688 = sst [smem:[#allocation23_spill]] %s2138_s18  ;;  %s333_s22 = sadd.s32 1, %s2126_s15 }
  0x12   : > { %p48_p0 = scmp.ge.s32.totalorder %s46_s21, 2  ;;  %p343_p1 = scmp.ne.s32.totalorder %s2126_s15, %s2122_s30 }
  0x13   : > { %p344_p2 = scmp.eq.s32.totalorder %s1579_s19, 1  ;;  %p349_p3 = scmp.ne.s32.totalorder %s2122_s30, %s2118_s29 }
  0x14   : > { %s2716_s21 = smov (%p48_p0, %s46_s21), 0  ;;  %p350_p5 = scmp.eq.s32.totalorder %s1580_s20, 1 }
  0x15   : > { %2689 = sst [smem:[#allocation24_spill]] %s2716_s21  ;;  %p2278_p4 = por %p344_p2, %p343_p1 }
  0x16   : > { %s328_s24 = ssub.s32 %s2134_s17, %s2716_s21  ;;  %p1581_p6 = scmp.ge.s32.totalorder %s2138_s18, 1 }
  0x17   : > { %s2690_s23 = scalar_select %p2278_p4, 1, 0 }
  0x18   : > { %p331_p7 = scmp.eq.s32.totalorder %s328_s24, 0  ;;  %p2285_p8 = por %p350_p5, %p349_p3 }
  0x19   : > { %p385_p9 = scmp.lt.s32.totalorder %s2138_s18, 3  ;;  %p2297_p11 = scmp.eq.s32.totalorder %s1579_s19, 0 }
  0x1a   : > { %s2691_s25 = scalar_select %p2285_p8, 1, 0 }
  0x1b   : > { %s2291_s26 = scalar_select %p331_p7, %s2126_s15, %s333_s22  }
  0x1c   : > { %2692 = sst [smem:[#allocation25_spill]] %s2691_s25  ;;  %p2293_p10 = pnand %p1581_p6, %p385_p9 }
  0x1d   : > { %2693 = sst [smem:[#allocation26_spill]] %s2291_s26  ;;  %s2140_s20 = smov [#allocation7]  }
  0x1e   : > { %s2694_s27 = scalar_select %p2293_p10, 1, 0 }
  0x1f   : > { %s2695_s28 = scalar_select %p2297_p11, 1, 0 }
  0x20   : > { %p1772_p12 = pneg %p2293_p10  ;;  %s421_s24 = sshll.u32 %s2140_s20, 4  ;;  %s422_s24 = int_to_ptr.vmem [resolvable:$true] %s421_s24 }
  0x21   : > { %s2141_s22 = smov [#allocation4]   ;;  %s2697_s6 = sld [smem:[#allocation27_spill]] }
  0x22   : > { %p2305_p13 = pnand %p2297_p11, %p1772_p12  ;;  %s407_s17 = sshll.u32 %s2141_s22, 4  ;;  %s2309_s17 = int_to_ptr.vmem [resolvable:$true] %s407_s17 }
  0x24   : > { %p2319_p1 = pneg %p2305_p13 }
  0x27   : > { %s1904_s15 = scalar_lea.hbm %s2697_s6, 16 }
  0x28   : > { %p1905_p0 = scmp.ne.s32.totalorder %s2697_s6, %s1904_s15  ;;  %p1911_p5 = scmp.lt.u32.totalorder %s1904_s15, %s2697_s6 }
  0x2a   : > { %p1907_p2 = pnand %p2319_p1, %p1905_p0 }
  0x2c   : > { %p1908_p3 = pneg %p1907_p2 }
  0x2e   : > { %p1913_p6 = pnand %p1911_p5, %p1908_p3 }
  0x30   : > { %1916 = shalt.err (!%p1913_p6)
}
  0x31   : > { %s1917_s26 = scalar_lea.vmem %s422_s24, 16  ;;  %s1924_s29 = scalar_lea.vmem %s422_s24, 32 }
  0x32   : > { %p1918_p7 = scmp.ne.s32.totalorder %s422_s24, %s1917_s26  ;;  %p1925_p8 = scmp.lt.s32.totalorder %s422_s24, %s422_s24 }
  0x33   : > { %p1926_p4 = scmp.lt.s32.totalorder %s1924_s29, %s1917_s26 }
  0x34   : > { %p1920_p9 = pnand %p1918_p7, %p2319_p1 }
  0x35   : > { %p1927_p11 = por %p1926_p4, %p1925_p8 }
  0x36   : > { %p1921_p12 = pneg %p1920_p9 }
  0x38   : > { %p1928_p10 = pnand %p1927_p11, %p1921_p12 }
  0x3a   : > { %1931 = shalt.err (!%p1928_p10)
}
  0x3b   : > { %1778 = dma.hbm_to_vmem [thread:$0]  (!%p2305_p13), %s2697_s6, 16, %s422_s24, [#allocation8]  }
  0x3c   : > { %s1932_s22 = scalar_lea.hbm %s2657_s4, 16 }
  0x3d   : > { %p1933_p0 = scmp.ne.s32.totalorder %s2657_s4, %s1932_s22  ;;  %p1939_p8 = scmp.lt.u32.totalorder %s1932_s22, %s2657_s4 }
  0x3f   : > { %p1935_p2 = pnand %p1933_p0, %p2319_p1 }
  0x41   : > { %p1936_p4 = pneg %p1935_p2 }
  0x43   : > { %p1941_p10 = pnand %p1939_p8, %p1936_p4 }
  0x45   : > { %1944 = shalt.err (!%p1941_p10)
}
  0x46   : > { %s1945_s24 = scalar_lea.vmem %s2309_s17, 16  ;;  %s1952_s12 = scalar_lea.vmem %s2309_s17, 32 }
  0x47   : > { %p1946_p11 = scmp.ne.s32.totalorder %s2309_s17, %s1945_s24  ;;  %p1953_p6 = scmp.lt.s32.totalorder %s2309_s17, %s2309_s17 }
  0x48   : > { %p1954_p7 = scmp.lt.s32.totalorder %s1952_s12, %s1945_s24 }
  0x49   : > { %p1948_p3 = pnand %p1946_p11, %p2319_p1 }
  0x4a   : > { %p1955_p9 = por %p1954_p7, %p1953_p6 }
  0x4b   : > { %p1949_p5 = pneg %p1948_p3 }
  0x4d   : > { %p1956_p12 = pnand %p1955_p9, %p1949_p5 }
  0x4f   : > { %1959 = shalt.err (!%p1956_p12)
}
  0x50   : > { %1775 = dma.hbm_to_vmem [thread:$0]  (!%p2305_p13), %s2657_s4, 16, %s2309_s17, [#allocation5]  }
  0x51   : > { %s2142_s19 = smov [#allocation9]   ;;  %s2143_s18 = smov [#allocation10]  }
  0x52   : > { %s432_s15 = sshll.u32 %s2142_s19, 4  ;;  %s443_s22 = sshll.u32 %s2143_s18, 4  ;;  %s433_s15 = int_to_ptr.vmem [resolvable:$true] %s432_s15  ;;  %s444_s22 = int_to_ptr.vmem [resolvable:$true] %s443_s22 }
  0x53   : > { %s1960_s24 = scalar_lea.hbm %s2660_s7, 16 }
  0x54   : > { %p1961_p0 = scmp.ne.s32.totalorder %s2660_s7, %s1960_s24  ;;  %p1967_p8 = scmp.lt.u32.totalorder %s1960_s24, %s2660_s7 }
  0x56   : > { %p1963_p2 = pnand %p1961_p0, %p2319_p1 }
  0x58   : > { %p1964_p4 = pneg %p1963_p2 }
  0x5a   : > { %p1969_p10 = pnand %p1967_p8, %p1964_p4 }
  0x5c   : > { %1972 = shalt.err (!%p1969_p10)
}
  0x5d   : > { %s1973_s17 = scalar_lea.vmem %s433_s15, 16  ;;  %s1980_s25 = scalar_lea.vmem %s433_s15, 32 }
  0x5e   : > { %p1974_p11 = scmp.ne.s32.totalorder %s433_s15, %s1973_s17  ;;  %p1981_p6 = scmp.lt.s32.totalorder %s433_s15, %s433_s15 }
  0x5f   : > { %p1982_p7 = scmp.lt.s32.totalorder %s1980_s25, %s1973_s17 }
  0x60   : > { %p1976_p3 = pnand %p1974_p11, %p2319_p1 }
  0x61   : > { %p1983_p9 = por %p1982_p7, %p1981_p6 }
  0x62   : > { %p1977_p5 = pneg %p1976_p3 }
  0x64   : > { %p1984_p12 = pnand %p1983_p9, %p1977_p5 }
  0x66   : > { %1987 = shalt.err (!%p1984_p12)
}
  0x67   : > { %1781 = dma.hbm_to_vmem [thread:$0]  (!%p2305_p13), %s2660_s7, 16, %s433_s15, [#allocation8]  }
  0x68   : > { %s1988_s26 = scalar_lea.hbm %s2661_s8, 16 }
  0x69   : > { %p1989_p0 = scmp.ne.s32.totalorder %s2661_s8, %s1988_s26  ;;  %p1995_p8 = scmp.lt.u32.totalorder %s1988_s26, %s2661_s8 }
  0x6b   : > { %p1991_p2 = pnand %p1989_p0, %p2319_p1 }
  0x6d   : > { %p1992_p4 = pneg %p1991_p2 }
  0x6f   : > { %p1997_p10 = pnand %p1995_p8, %p1992_p4 }
  0x71   : > { %2000 = shalt.err (!%p1997_p10)
}
  0x72   : > { %s2001_s17 = scalar_lea.vmem %s444_s22, 16  ;;  %s2008_s15 = scalar_lea.vmem %s444_s22, 32 }
  0x73   : > { %p2002_p11 = scmp.ne.s32.totalorder %s444_s22, %s2001_s17  ;;  %p2009_p6 = scmp.lt.s32.totalorder %s444_s22, %s444_s22 }
  0x74   : > { %p2010_p7 = scmp.lt.s32.totalorder %s2008_s15, %s2001_s17 }
  0x75   : > { %p2004_p3 = pnand %p2002_p11, %p2319_p1 }
  0x76   : > { %p2011_p9 = por %p2010_p7, %p2009_p6 }
  0x77   : > { %p2005_p5 = pneg %p2004_p3 }
  0x79   : > { %p2012_p12 = pnand %p2011_p9, %p2005_p5 }
  0x7b   : > { %2015 = shalt.err (!%p2012_p12)
}
  0x7c   : > { %1784 = dma.hbm_to_vmem [thread:$0]  (!%p2305_p13), %s2661_s8, 16, %s444_s22, [#allocation11]  }
  0x7d   : > { %p2699_p0 = scmp.ne.s32.totalorder %s2694_s27, 0 }
  0x7e   : > { %p2700_p2 = scmp.ne.s32.totalorder (!%p2699_p0), %s2695_s28, 0 }
  0x7f   : > { %475 = sbr.rel (%p2699_p0) target bundleno = 2738 (0xab2), region = 72 }
  0x86   : > { %2097 = dma.done.wait (%p2700_p2), [#allocation5], 16  }
  0x87   : > { %2099 = vsyncadd (%p2700_p2), [#allocation5], 4294967280 }
  0x88   : > { %2101 = dma.done.wait (%p2700_p2), [#allocation8], 32  }
  0x89   : > { %2103 = vsyncadd (%p2700_p2), [#allocation8], 4294967264 }
  0x8a   : > { %2105 = dma.done.wait (%p2700_p2), [#allocation11], 16  }
  0x8b   : > { %2107 = vsyncadd (%p2700_p2), [#allocation11], 4294967280  ;;  %p537_p13 = scmp.lt.s32.totalorder %s2130_s16, 1  ;;  %vm549_vm0 = vcmask 261120   ;;  %v1870_v7 = vld [vmem:[%s2656_s3] sm:$0xff]   ;;  %v2144_v8 = vmov 0.0  }
  0x8c   : > { %1668 = vmatprep.subr.bf16.mxu0 %v2144_v8  ;;  %vm2145_vm1 = vmmov 0   ;;  %v1871_v9 = vld [vmem:[%s2656_s3 + $0x8] sm:$0xff]   ;;  %1676 = vmatprep.subr.bf16.mxu1 %v2144_v8  ;;  %v1595_v14 = vld [vmem:[%s2654_s1] ss:$0 sm:$0xff]  ;;  %vm646_vm2 = vcmask 781312   ;;  %s2146_s17 = smov 96  }
  0x8d   : > { %s538_s21 = scalar_select %p537_p13, %s2130_s16, 1  ;;  %1672 = vmatprep.mubr.msk.bf16.mxu0 %vm2145_vm1, %v2144_v8  ;;  %1669 = vmatpush3.bf16.msra.mxu0 %v1870_v7  ;;  %v1596_v16 = vld [vmem:[%s2655_s2] ss:$0 sm:$0xff]  ;;  %v1597_v20 = vld [vmem:[#allocation4] ss:$0 sm:$0xff]  ;;  %vm662_vm3 = vcmask 64512  }
  0x8e   : > { %1670 = vmatprep.subr.bf16.mxu0 %v2144_v8  ;;  %1678 = vmatprep.mubr.msk.bf16.mxu1 %vm2145_vm1, %v2144_v8  ;;  %s2147_s15 = smov 120   ;;  %s2148_s25 = smov 88   ;;  %vm728_vm4 = vcmask 1043456   ;;  %vm893_vm5 = vcmask 130112   ;;  %vm1012_vm6 = vcmask 195712   ;;  %vm1131_vm7 = vcmask 261312  }
  0x8f   : > { %s1594_s27 = sshll.u32 %s538_s21, 3  ;;  %s2149_s6 = smov 80   ;;  %vm1349_vm8 = vcmask 523264  }
  0x90   : > { %s540_s19 = scalar_lea.vmem %s2653_s0, %s1594_s27  ;;  %s2150_s21 = smov 112  }
  0x91   : > { %v2414_v0 = vld [vmem:[%s540_s19] sm:$0xff]  ;;  %1671 = vmatpush3.bf16.msra.mxu0 %v1871_v9  ;;  %s2151_s27 = smov 72   ;;  %s2152_s20 = smov 104  }
  0x92   : > { %v550_v1 = vsel %vm549_vm0, %v2414_v0, 0.0  ;;  %1682 = vmatprep.subr.bf16.mxu0 %v2144_v8  ;;  %s2153_s22 = smov 64   ;;  %s2154_s19 = smov 56  }
  0x93   : > { %551 = vadd.xlane.f32.xlu0 %v550_v1  ;;  %s2155_s28 = smov 48   ;;  %s2156_s14 = smov 40  }
  0x94   : > { %s2483_s18 = sand.u32 1, %s2122_s30   ;;  %s2157_s24 = smov 8  }
  0x95   : > { %s1593_s26 = sshll.u32 %s2483_s18, 5  ;;  %p2702_p4 = scmp.ne.s32.totalorder %s2690_s23, 0 }
  0x96   : > { %s2487_s29 = scalar_lea.vmem [#allocation13], %s1593_s26  ;;  %s2160_s12 = smov [#allocation13]  }
  0x97   : > { %s2020_s13 = sshll.u32 %s2160_s12, 4  ;;  %s2021_s13 = int_to_ptr.vmem [resolvable:$false] %s2020_s13 }
 0x120   : > { %v552_v2 = vpop.xlane.xlu0 %551 }
 0x121   : > { %v554_v3 = vmul.f32 0.03125, %v552_v2 }
 0x123   : > { %v555_v4 = vsub.f32 %v2414_v0, %v554_v3 }
 0x125   : > { %v556_v5 = vmul.f32 %v555_v4, %v555_v4 }
 0x127   : > { %v557_v6 = vsel %vm549_vm0, %v556_v5, 0.0 }
 0x128   : > { %558 = vadd.xlane.f32.xlu0 %v557_v6 }
 0x1b5   : > { %v559_v10 = vpop.xlane.xlu0 %558 }
 0x1b6   : > { %v560_v11 = vmul.f32 0.03125, %v559_v10 }
 0x1b8   : > { %v561_v12 = vadd.f32 1e-05, %v560_v11 }
 0x1ba   : > { %1882 = vrsqrt.f32 %v561_v12 }
 0x1c4   : > { %v1883_v13 = vpop.eup %1882 }
 0x1c5   : > { %v563_v15 = vmul.f32 %v1883_v13, %v555_v4 }
 0x1c7   : > { %v570_v17 = vmul.f32 %v1595_v14, %v563_v15 }
 0x1c9   : > { %v577_v18 = vadd.f32 %v1596_v16, %v570_v17 }
 0x1cb   : > { %v578_v19 = vpack.c.bf16 %v577_v18, %v577_v18 }
 0x1cd   : > { %1673 = vmatmul.mubr.msk.bf16.vlgmr.msra.gmra.mrb[0].mxu0 %vm549_vm0, %v578_v19 }
 0x1ce   : > { %1684 = vmatprep.mubr.msk.bf16.mxu0 %vm2145_vm1, %v2144_v8 }
 0x2a0   : > { %v639_v21 = vpop.f32.mrb[0].mxu0 }
 0x2a1   : > { %v640_v22 = vadd.f32 %v1597_v20, %v639_v21  ;;  %v1674_v23 = vpop.f32.mrb[1].mxu0 }
 0x2a2   : > { %v642_v24 = vpop.f32.mrb[2].mxu0 }
 0x2a3   : > { %v645_v25 = vpack.c.bf16 %v640_v22, %v640_v22  ;;  %v1675_v26 = vpop.f32.mrb[3].mxu0 }
 0x2a5   : > { %647 = vst.msk [vmem:[#allocation2] sm:$0xf] %vm646_vm2, %v645_v25 }
 0x2ac   : > { %v2443_v27 = vld [vmem:[#allocation2] ss:$0 sps:$4 sm:$0xff]  }
 0x2ad   : > { %v655_v28 = vld [vmem:[#allocation2] sm:$0xf]  ;;  %660 = vrot.lane.b32.xlu1 %v2443_v27, %s2146_s17 }
 0x2ae   : > { %v1604_v29 = vcombine.low %v655_v28, %v655_v28 }
 0x2b0   : > { %776 = vrot.lane.b32.xlu0 %v1604_v29, %s2147_s15 }
 0x2b1   : > { %778 = vrot.lane.b32.xlu1 %v2443_v27, %s2148_s25  ;;  %s2158_s25 = smov 16  }
 0x2b5   : > { %897 = vrot.lane.b32.xlu1 %v2443_v27, %s2149_s6  ;;  %s2159_s6 = smov 24  }
 0x2b9   : > { %895 = vrot.lane.b32.xlu1 %v1604_v29, %s2150_s21  ;;  %s1429_s21 = sshll.u32 %s2487_s29, 4  ;;  %s2563_s21 = int_to_ptr.vmem [resolvable:$true] %s1429_s21 }
 0x2ba   : > { %s2016_s26 = scalar_lea.vmem %s2563_s21, 512  ;;  %p2023_p11 = scmp.lt.s32.totalorder %s2563_s21, %s2021_s13 }
 0x2bb   : > { %p2017_p1 = scmp.ne.s32.totalorder %s2563_s21, %s2016_s26 }
 0x2bd   : > { %1016 = vrot.lane.b32.xlu1 %v2443_v27, %s2151_s27  ;;  %s1637_s27 = sshll.u32 %s2130_s16, 9  ;;  %p2018_p8 = pnand %p2017_p1, %p2702_p4 }
 0x2bf   : > { %p2019_p10 = pneg %p2018_p8 }
 0x2c1   : > { %1014 = vrot.lane.b32.xlu1 %v1604_v29, %s2152_s20 }
 0x31f   : > { %v661_v30 = vpop.permute.xlu1 %660 }
 0x320   : > { %v667_v31 = vsel %vm662_vm3, %v661_v30, 0 }
 0x321   : > { %1677 = vmatpush3.bf16.xpose.msra.mxu1 %v667_v31 }
 0x322   : > { %1688 = vmatprep.subr.bf16.mxu1 %v2144_v8  ;;  %v777_v35 = vpop.permute.xlu0 %776 }
 0x323   : > { %v779_v32 = vpop.permute.xlu1 %778 }
 0x324   : > { %v784_v33 = vsel %vm662_vm3, %v779_v32, 0 }
 0x327   : > { %v898_v34 = vpop.permute.xlu1 %897 }
 0x328   : > { %1679 = vmatmul.mubr.msk.bf16.vlgmr.msra.gmra.mrb[0].mxu1 %vm662_vm3, %v655_v28  ;;  %v903_v37 = vsel %vm662_vm3, %v898_v34, 0 }
 0x329   : > { %1689 = vmatpush3.bf16.xpose.msra.mxu1 %v784_v33  ;;  %1690 = vmatprep.mubr.msk.bf16.mxu1 %vm2145_vm1, %v2144_v8 }
 0x32a   : > { %1700 = vmatprep.subr.bf16.mxu1 %v2144_v8 }
 0x32b   : > { %v896_v36 = vpop.permute.xlu1 %895 }
 0x32f   : > { %v1017_v38 = vpop.permute.xlu1 %1016 }
 0x330   : > { %1691 = vmatmul.mubr.msk.bf16.vlgmr.msra.gmra.mrb[4].mxu1 %vm662_vm3, %v777_v35  ;;  %v1022_v39 = vsel %vm662_vm3, %v1017_v38, 0 }
 0x331   : > { %1701 = vmatpush3.bf16.xpose.msra.mxu1 %v903_v37  ;;  %1702 = vmatprep.mubr.msk.bf16.mxu1 %vm2145_vm1, %v2144_v8 }
 0x332   : > { %1712 = vmatprep.subr.bf16.mxu1 %v2144_v8 }
 0x333   : > { %v1015_v40 = vpop.permute.xlu1 %1014 }
 0x338   : > { %1703 = vmatmul.mubr.msk.bf16.vlgmr.msra.gmra.mrb[8].mxu1 %vm662_vm3, %v896_v36 }
 0x339   : > { %1713 = vmatpush3.bf16.xpose.msra.mxu1 %v1022_v39  ;;  %1714 = vmatprep.mubr.msk.bf16.mxu1 %vm2145_vm1, %v2144_v8 }
 0x33a   : > { %1724 = vmatprep.subr.bf16.mxu1 %v2144_v8 }
 0x340   : > { %1715 = vmatmul.mubr.msk.bf16.vlgmr.msra.gmra.mrb[12].mxu1 %vm662_vm3, %v1015_v40 }
 0x341   : > { %1728 = vmatprep.mubr.msk.bf16.mxu1 %vm2145_vm1, %v2144_v8 }
 0x3fb   : > { %v703_v41 = vpop.f32.mrb[0].mxu1 }
 0x3fc   : > { %v709_v42 = vmul.f32 0.35355338, %v703_v41  ;;  %v1680_v43 = vpop.f32.mrb[1].mxu1 }
 0x3fd   : > { %v706_v44 = vpop.f32.mrb[2].mxu1 }
 0x3fe   : > { %v1681_v45 = vpop.f32.mrb[3].mxu1  ;;  %v710_v46 = vsel %vm662_vm3, %v709_v42, -inf }
 0x3ff   : > { %711 = vmax.xlane.f32.xlu1 %v710_v46 }
 0x403   : > { %v820_v47 = vpop.f32.mrb[4].mxu1 }
 0x404   : > { %v826_v48 = vmul.f32 0.35355338, %v820_v47  ;;  %v1692_v49 = vpop.f32.mrb[5].mxu1 }
 0x405   : > { %v823_v50 = vpop.f32.mrb[6].mxu1 }
 0x406   : > { %v1693_v51 = vpop.f32.mrb[7].mxu1  ;;  %v827_v52 = vsel %vm662_vm3, %v826_v48, -inf }
 0x407   : > { %828 = vmax.xlane.f32.xlu0 %v827_v52 }
 0x40b   : > { %v939_v53 = vpop.f32.mrb[8].mxu1 }
 0x40c   : > { %v945_v54 = vmul.f32 0.35355338, %v939_v53  ;;  %v1704_v55 = vpop.f32.mrb[9].mxu1 }
 0x40d   : > { %v942_v56 = vpop.f32.mrb[10].mxu1  ;;  %v1874_v55 = vld [vmem:[%s2658_s5] sm:$0xff]  }
 0x40e   : > { %v1705_v57 = vpop.f32.mrb[11].mxu1  ;;  %v946_v58 = vsel %vm662_vm3, %v945_v54, -inf  ;;  %1725 = vmatpush3.bf16.msra.mxu1 %v1874_v55  ;;  %v1875_v56 = vld [vmem:[%s2658_s5 + $0x8] sm:$0xff]  }
 0x40f   : > { %947 = vmax.xlane.f32.xlu1 %v946_v58  ;;  %1726 = vmatprep.subr.bf16.mxu1 %v2144_v8 }
 0x412   : > { %1727 = vmatpush3.bf16.msra.mxu1 %v1875_v56 }
 0x413   : > { %v1058_v59 = vpop.f32.mrb[12].mxu1  ;;  %1740 = vmatprep.subr.bf16.mxu1 %v2144_v8 }
 0x414   : > { %v1064_v60 = vmul.f32 0.35355338, %v1058_v59  ;;  %v1716_v61 = vpop.f32.mrb[13].mxu1 }
 0x415   : > { %v1061_v62 = vpop.f32.mrb[14].mxu1 }
 0x416   : > { %v1717_v63 = vpop.f32.mrb[15].mxu1  ;;  %v1065_v1 = vsel %vm662_vm3, %v1064_v60, -inf }
 0x417   : > { %1066 = vmax.xlane.f32.xlu0 %v1065_v1 }
 0x48c   : > { %v712_v2 = vpop.xlane.xlu1 %711 }
 0x48d   : > { %v713_v3 = vsub.f32 %v709_v42, %v712_v2 }
 0x48f   : > { %v714_v4 = vmul.f32 1.442695, %v713_v3 }
 0x491   : > { %1884 = vpow2.f32 %v714_v4 }
 0x494   : > { %v829_v5 = vpop.xlane.xlu0 %828 }
 0x495   : > { %v830_v6 = vsub.f32 %v826_v48, %v829_v5 }
 0x497   : > { %v831_v7 = vmul.f32 1.442695, %v830_v6 }
 0x499   : > { %1886 = vpow2.f32 %v831_v7  ;;  %v1614_v7 = vld [vmem:[#allocation7] ss:$0 sm:$0xff] }
 0x49b   : > { %v1885_v9 = vpop.eup %1884 }
 0x49c   : > { %v716_v10 = vsel %vm662_vm3, %v1885_v9, 0.0  ;;  %v948_v18 = vpop.xlane.xlu1 %947 }
 0x49d   : > { %717 = vadd.xlane.f32.xlu1 %v716_v10  ;;  %v949_v19 = vsub.f32 %v945_v54, %v948_v18 }
 0x49f   : > { %v950_v20 = vmul.f32 1.442695, %v949_v19 }
 0x4a3   : > { %v1887_v11 = vpop.eup %1886 }
 0x4a4   : > { %v1067_v12 = vpop.xlane.xlu0 %1066  ;;  %v833_v13 = vsel %vm662_vm3, %v1887_v11, 0.0 }
 0x4a5   : > { %v1068_v14 = vsub.f32 %v1064_v60, %v1067_v12  ;;  %834 = vadd.xlane.f32.xlu0 %v833_v13 }
 0x4a7   : > { %v1069_v15 = vmul.f32 1.442695, %v1068_v14 }
 0x4a9   : > { %1888 = vpow2.f32 %v1069_v15 }
 0x4aa   : > { %1890 = vpow2.f32 %v950_v20 }
 0x4ae   : > { %723 = vrot.lane.b32.xlu1 %v2443_v27, %s2153_s22 }
 0x4b3   : > { %v1889_v16 = vpop.eup %1888 }
 0x4b4   : > { %v1071_v17 = vsel %vm662_vm3, %v1889_v16, 0.0  ;;  %v1891_v21 = vpop.eup %1890 }
 0x4b5   : > { %1072 = vadd.xlane.f32.xlu0 %v1071_v17  ;;  %v952_v22 = vsel %vm662_vm3, %v1891_v21, 0.0 }
 0x4cb   : > { %841 = vrot.lane.b32.xlu0 %v2443_v27, %s2154_s19  ;;  %s2701_s19 = sld [smem:[#allocation30_spill]] }
 0x4d2   : > { %953 = vadd.xlane.f32.xlu1 %v952_v22 }
 0x4e3   : > { %960 = vrot.lane.b32.xlu1 %v2443_v27, %s2155_s28  ;;  %s2568_s28 = scalar_lea.hbm %s2701_s19, %s1637_s27 }
 0x4e7   : > { %1079 = vrot.lane.b32.xlu1 %v2443_v27, %s2156_s14  ;;  %s1401_s14 = scalar_lea.sflag [#allocation14], %s2483_s18 }
 0x52a   : > { %v718_v23 = vpop.xlane.xlu1 %717 }
 0x52b   : > { %1892 = vrcp.f32 %v718_v23 }
 0x52e   : > { %v724_v24 = vpop.permute.xlu1 %723 }
 0x52f   : > { %v730_v25 = vsel %vm728_vm4, %v724_v24, 0 }
 0x530   : > { %1683 = vmatpush3.bf16.msra.mxu0 %v730_v25 }
 0x531   : > { %1694 = vmatprep.subr.bf16.mxu0 %v2144_v8 }
 0x532   : > { %v835_v26 = vpop.xlane.xlu0 %834 }
 0x533   : > { %1894 = vrcp.f32 %v835_v26  ;;  %v1618_v26 = vld [vmem:[#allocation9] ss:$0 sm:$0xff] }
 0x535   : > { %v1893_v28 = vpop.eup %1892 }
 0x536   : > { %v720_v29 = vmul.f32 %v1893_v28, %v1885_v9 }
 0x538   : > { %v722_v30 = vpack.c.bf16 %v720_v29, %v720_v29  ;;  %721 = vst.msk [vmem:[%s2487_s29] sm:$0xff] %vm662_vm3, %v720_v29  ;;  %v1619_v29 = vld [vmem:[#allocation10] ss:$0 sm:$0xff] }
 0x53a   : > { %1685 = vmatmul.mubr.msk.bf16.vlgmr.msra.gmra.mrb[4].mxu0 %vm662_vm3, %v722_v30 }
 0x53b   : > { %1696 = vmatprep.mubr.msk.bf16.mxu0 %vm2145_vm1, %v2144_v8 }
 0x53d   : > { %v1895_v27 = vpop.eup %1894 }
 0x53e   : > { %v837_v31 = vmul.f32 %v1895_v27, %v1887_v11 }
 0x540   : > { %1606 = vst.msk [vmem:[%s2487_s29 + $0x8] sm:$0xff] %vm662_vm3, %v837_v31  ;;  %v840_v35 = vpack.c.bf16 %v837_v31, %v837_v31 }
 0x542   : > { %v1073_v32 = vpop.xlane.xlu0 %1072 }
 0x543   : > { %1896 = vrcp.f32 %v1073_v32  ;;  %v1878_v32 = vld [vmem:[%s2664_s11] sm:$0xff]  }
 0x546   : > { %v842_v33 = vpop.permute.xlu0 %841 }
 0x547   : > { %v847_v34 = vsel %vm728_vm4, %v842_v33, 0  ;;  %v1879_v33 = vld [vmem:[%s2664_s11 + $0x8] sm:$0xff]  }
 0x548   : > { %1695 = vmatpush3.bf16.msra.mxu0 %v847_v34  ;;  %v1880_v34 = vld [vmem:[%s2664_s11 + $0x10] sm:$0xff]  }
 0x549   : > { %1706 = vmatprep.subr.bf16.mxu0 %v2144_v8 }
 0x54b   : > { %1697 = vmatmul.mubr.msk.bf16.vlgmr.msra.gmra.mrb[8].mxu0 %vm662_vm3, %v840_v35  ;;  %v1881_v35 = vld [vmem:[%s2664_s11 + $0x18] sm:$0xff]  }
 0x54c   : > { %1708 = vmatprep.mubr.msk.bf16.mxu0 %vm2145_vm1, %v2144_v8 }
 0x54d   : > { %v1897_v36 = vpop.eup %1896 }
 0x54e   : > { %v1075_v37 = vmul.f32 %v1897_v36, %v1889_v16  ;;  %v1620_v36 = vld [vmem:[%s2663_s10] ss:$0 sm:$0xff] }
 0x550   : > { %1612 = vst.msk [vmem:[%s2487_s29 + $0x18] sm:$0xff] %vm662_vm3, %v1075_v37  ;;  %v1078_v46 = vpack.c.bf16 %v1075_v37, %v1075_v37 }
 0x55f   : > { %v954_v38 = vpop.xlane.xlu1 %953 }
 0x560   : > { %1898 = vrcp.f32 %v954_v38 }
 0x563   : > { %v961_v39 = vpop.permute.xlu1 %960 }
 0x564   : > { %v966_v40 = vsel %vm728_vm4, %v961_v39, 0 }
 0x565   : > { %1707 = vmatpush3.bf16.msra.mxu0 %v966_v40 }
 0x566   : > { %1718 = vmatprep.subr.bf16.mxu0 %v2144_v8 }
 0x567   : > { %v1080_v43 = vpop.permute.xlu1 %1079 }
 0x568   : > { %v1085_v45 = vsel %vm728_vm4, %v1080_v43, 0 }
 0x56a   : > { %v1899_v41 = vpop.eup %1898 }
 0x56b   : > { %v956_v42 = vmul.f32 %v1899_v41, %v1891_v21  ;;  %v1876_v21 = vld [vmem:[%s2662_s9] sm:$0xff]  }
 0x56d   : > { %v959_v44 = vpack.c.bf16 %v956_v42, %v956_v42  ;;  %1609 = vst.msk [vmem:[%s2487_s29 + $0x10] sm:$0xff] %vm662_vm3, %v956_v42  ;;  %s2022_s29 = scalar_lea.vmem %s2021_s13, 1024 }
 0x56e   : > { %p2024_p3 = scmp.lt.s32.totalorder %s2022_s29, %s2016_s26 }
 0x56f   : > { %1709 = vmatmul.mubr.msk.bf16.vlgmr.msra.gmra.mrb[12].mxu0 %vm662_vm3, %v959_v44 }
 0x570   : > { %1719 = vmatpush3.bf16.msra.mxu0 %v1085_v45  ;;  %1720 = vmatprep.mubr.msk.bf16.mxu0 %vm2145_vm1, %v2144_v8  ;;  %p2025_p5 = por %p2024_p3, %p2023_p11 }
 0x571   : > { %1732 = vmatprep.subr.bf16.mxu0 %v2144_v8 }
 0x572   : > { %p2026_p6 = pnand %p2025_p5, %p2019_p10 }
 0x577   : > { %1721 = vmatmul.mubr.msk.bf16.vlgmr.msra.gmra.mrb[16].mxu0 %vm662_vm3, %v1078_v46 }
 0x578   : > { %1736 = vmatprep.mubr.msk.bf16.mxu0 %vm2145_vm1, %v2144_v8  ;;  %1733 = vmatpush3.bf16.msra.mxu0 %v1876_v21 }
 0x579   : > { %1734 = vmatprep.subr.bf16.mxu0 %v2144_v8 }
 0x60d   : > { %v766_v47 = vpop.f32.mrb[4].mxu0 }
 0x60e   : > { %772 = vst.msk [vmem:[#allocation3] sm:$0xff] %vm662_vm3, %v766_v47  ;;  %v1686_v48 = vpop.f32.mrb[5].mxu0 }
 0x60f   : > { %v769_v49 = vpop.f32.mrb[6].mxu0 }
 0x610   : > { %v1687_v50 = vpop.f32.mrb[7].mxu0 }
 0x61e   : > { %v883_v51 = vpop.f32.mrb[8].mxu0 }
 0x61f   : > { %890 = vrot.lane.b32.xlu0 %v883_v51, %s2157_s24  ;;  %v1698_v52 = vpop.f32.mrb[9].mxu0 }
 0x620   : > { %v886_v53 = vpop.f32.mrb[10].mxu0 }
 0x621   : > { %v1699_v54 = vpop.f32.mrb[11].mxu0 }
 0x642   : > { %v1002_v57 = vpop.f32.mrb[12].mxu0 }
 0x643   : > { %1009 = vrot.lane.b32.xlu1 %v1002_v57, %s2158_s25  ;;  %v1710_v58 = vpop.f32.mrb[13].mxu0 }
 0x644   : > { %v1005_v59 = vpop.f32.mrb[14].mxu0 }
 0x645   : > { %v1711_v60 = vpop.f32.mrb[15].mxu0 }
 0x64a   : > { %v1121_v61 = vpop.f32.mrb[16].mxu0 }
 0x64b   : > { %1128 = vrot.lane.b32.xlu0 %v1121_v61, %s2159_s6  ;;  %v1722_v62 = vpop.f32.mrb[17].mxu0 }
 0x64c   : > { %v1124_v63 = vpop.f32.mrb[18].mxu0 }
 0x64d   : > { %v1723_v1 = vpop.f32.mrb[19].mxu0 }
 0x691   : > { %v891_v2 = vpop.permute.xlu0 %890 }
 0x692   : > { %894 = vst.msk [vmem:[#allocation3] sm:$0xff] %vm893_vm5, %v891_v2 }
 0x6b5   : > { %v1010_v3 = vpop.permute.xlu1 %1009 }
 0x6b6   : > { %1013 = vst.msk [vmem:[#allocation3] sm:$0xff] %vm1012_vm6, %v1010_v3 }
 0x6bd   : > { %v1129_v4 = vpop.permute.xlu0 %1128 }
 0x6be   : > { %1132 = vst.msk [vmem:[#allocation3] sm:$0xff] %vm1131_vm7, %v1129_v4 }
 0x6c5   : > { %v1133_v5 = vld [vmem:[#allocation3] sm:$0xff] }
 0x6c6   : > { %v1134_v6 = vpack.c.bf16 %v1133_v5, %v1133_v5 }
 0x6c8   : > { %1729 = vmatmul.mubr.msk.bf16.vlgmr.msra.gmra.mrb[16].mxu1 %vm549_vm0, %v1134_v6 }
 0x6c9   : > { %1748 = vmatprep.mubr.msk.bf16.mxu1 %vm2145_vm1, %v2144_v8  ;;  %1741 = vmatpush3.bf16.msra.mxu1 %v1878_v32 }
 0x6ca   : > { %1742 = vmatprep.subr.bf16.mxu1 %v2144_v8 }
 0x6cd   : > { %1743 = vmatpush3.bf16.msra.mxu1 %v1879_v33 }
 0x6ce   : > { %1744 = vmatprep.subr.bf16.mxu1 %v2144_v8 }
 0x6d1   : > { %1745 = vmatpush3.bf16.msra.mxu1 %v1880_v34 }
 0x6d2   : > { %1746 = vmatprep.subr.bf16.mxu1 %v2144_v8 }
 0x6d5   : > { %1747 = vmatpush3.bf16.msra.mxu1 %v1881_v35 }
 0x79b   : > { %v1196_v9 = vpop.f32.mrb[16].mxu1 }
 0x79c   : > { %v1197_v10 = vadd.f32 %v1614_v7, %v1196_v9  ;;  %v1730_v11 = vpop.f32.mrb[17].mxu1 }
 0x79d   : > { %v1199_v12 = vpop.f32.mrb[18].mxu1 }
 0x79e   : > { %v2529_v13 = vadd.f32 %v1197_v10, %v2414_v0  ;;  %v1731_v14 = vpop.f32.mrb[19].mxu1  ;;  %v1877_v0 = vld [vmem:[%s2662_s9 + $0x8] sm:$0xff]  }
 0x79f   : > { %1735 = vmatpush3.bf16.msra.mxu0 %v1877_v0 }
 0x7a0   : > { %v1205_v15 = vsel %vm549_vm0, %v2529_v13, 0.0 }
 0x7a1   : > { %1206 = vadd.xlane.f32.xlu1 %v1205_v15 }
 0x82e   : > { %v1207_v16 = vpop.xlane.xlu1 %1206 }
 0x82f   : > { %v1209_v17 = vmul.f32 0.03125, %v1207_v16 }
 0x831   : > { %v1210_v18 = vsub.f32 %v2529_v13, %v1209_v17 }
 0x833   : > { %v1211_v19 = vmul.f32 %v1210_v18, %v1210_v18 }
 0x835   : > { %v1212_v20 = vsel %vm549_vm0, %v1211_v19, 0.0 }
 0x836   : > { %1213 = vadd.xlane.f32.xlu0 %v1212_v20 }
 0x8c3   : > { %v1214_v22 = vpop.xlane.xlu0 %1213 }
 0x8c4   : > { %v1215_v23 = vmul.f32 0.03125, %v1214_v22 }
 0x8c6   : > { %v1216_v24 = vadd.f32 1e-05, %v1215_v23 }
 0x8c8   : > { %1900 = vrsqrt.f32 %v1216_v24 }
 0x8d2   : > { %v1901_v25 = vpop.eup %1900 }
 0x8d3   : > { %v1218_v28 = vmul.f32 %v1901_v25, %v1210_v18 }
 0x8d5   : > { %v1225_v30 = vmul.f32 %v1618_v26, %v1218_v28 }
 0x8d7   : > { %v1232_v27 = vadd.f32 %v1619_v29, %v1225_v30 }
 0x8d9   : > { %v1233_v31 = vpack.c.bf16 %v1232_v27, %v1232_v27 }
 0x8db   : > { %1737 = vmatmul.mubr.msk.bf16.vlgmr.msra.gmra.mrb[20].mxu0 %vm549_vm0, %v1233_v31 }
 0x9ae   : > { %v1294_v37 = vpop.f32.mrb[20].mxu0 }
 0x9af   : > { %v1295_v38 = vadd.f32 %v1620_v36, %v1294_v37  ;;  %v1738_v39 = vpop.f32.mrb[21].mxu0 }
 0x9b0   : > { %v1297_v40 = vpop.f32.mrb[22].mxu0 }
 0x9b1   : > { %v1301_v41 = vmul.f32 0.044715, %v1295_v38  ;;  %v1739_v42 = vpop.f32.mrb[23].mxu0  ;;  %v1300_v47 = vmul.f32 0.5, %v1295_v38 }
 0x9b3   : > { %v1302_v43 = vmul.f32 %v1301_v41, %v1295_v38 }
 0x9b5   : > { %v1303_v44 = vmul.f32 %v1302_v43, %v1295_v38 }
 0x9b7   : > { %v1304_v45 = vadd.f32 %v1303_v44, %v1295_v38 }
 0x9b9   : > { %v1305_v46 = vmul.f32 0.7978846, %v1304_v45 }
 0x9bb   : > { %1902 = vtanh.f32 %v1305_v46 }
 0x9c5   : > { %v1903_v8 = vpop.eup %1902 }
 0x9c6   : > { %v1307_v48 = vadd.f32 1.0, %v1903_v8 }
 0x9c8   : > { %v1308_v49 = vmul.f32 %v1307_v48, %v1300_v47 }
 0x9ca   : > { %v1309_v50 = vpack.c.bf16 %v1308_v49, %v1308_v49 }
 0x9cc   : > { %1749 = vmatmul.mubr.msk.bf16.vlgmr.msra.gmra.mrb[20].mxu1 %vm1349_vm8, %v1309_v50 }
 0x9cd   : > { %2029 = shalt.err (!%p2026_p6)
}
 0x9ce   : > { %s2030_s17 = scalar_lea.hbm %s2568_s28, 512  ;;  %s2034_s6 = scalar_lea.hbm %s2701_s19, 1024 }
 0x9cf   : > { %p2031_p7 = scmp.ne.s32.totalorder %s2568_s28, %s2030_s17  ;;  %p2035_p0 = scmp.lt.u32.totalorder %s2568_s28, %s2701_s19 }
 0x9d0   : > { %p2036_p2 = scmp.lt.u32.totalorder %s2034_s6, %s2030_s17  ;;  %p2038_p1 = scmp.lt.u32.totalorder %s2030_s17, %s2568_s28 }
 0x9d1   : > { %p2032_p9 = pnand %p2031_p7, %p2702_p4 }
 0x9d2   : > { %p2037_p13 = por %p2036_p2, %p2035_p0 }
 0x9d3   : > { %p2033_p12 = pneg %p2032_p9 }
 0x9d4   : > { %p2039_p8 = por %p2038_p1, %p2037_p13 }
 0x9d6   : > { %p2040_p10 = pnand %p2039_p8, %p2033_p12 }
 0x9d8   : > { %2043 = shalt.err (!%p2040_p10)
}
 0x9d9   : > { %s2161_s22 = smov 128   ;;  %s1592_s26 = sshll.u32 %s2483_s18, 3 }
 0x9da   : > { %1769 = dma.vmem_to_hbm [thread:$0]  (%p2702_p4), %s2563_s21, 512, %s2568_s28, %s1401_s14, %s2161_s22, %s2161_s22, %s2157_s24  }
 0x9db   : > { %s2703_s29 = sld [smem:[#allocation28_spill]]  ;;  %s1632_s17 = sshll.u32 %s2130_s16, 7 }
 0x9dc   : > { %s529_s15 = scalar_lea.vmem [#allocation12], %s1592_s26  ;;  %s2704_s20 = sld [smem:[#allocation29_spill]] }
 0x9dd   : > { %s1415_s25 = sshll.u32 %s529_s15, 4  ;;  %s1396_s16 = scalar_lea.sflag [#allocation6], %s2483_s18  ;;  %s2606_s25 = int_to_ptr.vmem [resolvable:$true] %s1415_s25 }
 0x9de   : > { %s2044_s21 = scalar_lea.vmem %s2606_s25, 128  ;;  %s2162_s28 = smov [#allocation12]  }
 0x9df   : > { %p2045_p11 = scmp.ne.s32.totalorder %s2606_s25, %s2044_s21  ;;  %s2048_s14 = sshll.u32 %s2162_s28, 4  ;;  %s2049_s14 = int_to_ptr.vmem [resolvable:$false] %s2048_s14 }
 0x9e0   : > { %s2050_s22 = scalar_lea.vmem %s2049_s14, 256  ;;  %p2051_p6 = scmp.lt.s32.totalorder %s2606_s25, %s2049_s14 }
 0x9e1   : > { %v1624_v51 = vld [vmem:[%s2703_s29] ss:$0 sm:$0xff]  ;;  %p2046_p3 = pnand %p2045_p11, %p2702_p4  ;;  %p2052_p7 = scmp.lt.s32.totalorder %s2050_s22, %s2044_s21 }
 0x9e2   : > { %s2604_s24 = scalar_lea.hbm %s2704_s20, %s1632_s17 }
 0x9e3   : > { %p2047_p5 = pneg %p2046_p3  ;;  %p2053_p9 = por %p2052_p7, %p2051_p6 }
 0x9e5   : > { %p2054_p12 = pnand %p2053_p9, %p2047_p5 }
 0xa9f   : > { %v1387_v52 = vpop.f32.mrb[20].mxu1 }
 0xaa0   : > { %v1388_v53 = vadd.f32 %v1624_v51, %v1387_v52  ;;  %v1750_v54 = vpop.f32.mrb[21].mxu1 }
 0xaa1   : > { %v1390_v55 = vpop.f32.mrb[22].mxu1 }
 0xaa2   : > { %v1393_v56 = vadd.f32 %v1388_v53, %v2529_v13  ;;  %v1751_v57 = vpop.f32.mrb[23].mxu1 }
 0xaa4   : > { %1394 = vst.msk [vmem:[%s529_s15] sm:$0xff] %vm549_vm0, %v1393_v56 }
 0xaa5   : > { %2057 = shalt.err (!%p2054_p12)
}
 0xaa6   : > { %s2058_s18 = scalar_lea.hbm %s2604_s24, 128  ;;  %s2062_s13 = scalar_lea.hbm %s2704_s20, 256 }
 0xaa7   : > { %p2059_p0 = scmp.ne.s32.totalorder %s2604_s24, %s2058_s18  ;;  %p2063_p1 = scmp.lt.u32.totalorder %s2604_s24, %s2704_s20 }
 0xaa8   : > { %p2064_p8 = scmp.lt.u32.totalorder %s2062_s13, %s2058_s18  ;;  %p2066_p11 = scmp.lt.u32.totalorder %s2058_s18, %s2604_s24 }
 0xaa9   : > { %p2060_p2 = pnand %p2059_p0, %p2702_p4 }
 0xaaa   : > { %p2065_p10 = por %p2064_p8, %p2063_p1 }
 0xaab   : > { %p2061_p13 = pneg %p2060_p2 }
 0xaac   : > { %p2067_p3 = por %p2066_p11, %p2065_p10 }
 0xaae   : > { %p2068_p5 = pnand %p2067_p3, %p2061_p13 }
 0xab0   : > { %2071 = shalt.err (!%p2068_p5)
}
 0xab1   : > { %1768 = dma.vmem_to_hbm [thread:$0]  (%p2702_p4), %s2606_s25, 128, %s2604_s24, %s1396_s16  }
 0xab2 PF: > { %s2705_s15 = sld [smem:[#allocation23_spill]]  ;;  %s2706_s6 = sld [smem:[#allocation20_spill]] }
 0xab3   : > { %s2707_s27 = sld [smem:[#allocation25_spill]] }
 0xab8   : > { %p1800_p6 = scmp.ge.s32.totalorder %s2705_s15, 2  ;;  %s1444_s21 = sand.u32 1, %s2706_s6  }
 0xab9   : > { %p2708_p7 = scmp.ne.s32.totalorder %s2707_s27, 0  ;;  %s1445_s28 = scalar_lea.sflag [#allocation6], %s1444_s21 }
 0xabb   : > { %p1786_p9 = pnand %p1800_p6, %p2708_p7 }
 0xabd   : > { %2109 = dma.done.wait (!%p1786_p9), %s1445_s28, 128  }
 0xabe   : > { %2111 = vsyncadd (!%p1786_p9), %s1445_s28, 4294967168  ;;  %s1454_s14 = scalar_lea.sflag [#allocation14], %s1444_s21 }
 0xabf   : > { %2113 = dma.done.wait (!%p1786_p9), %s1454_s14, 512  }
 0xac0   : > { %2115 = vsyncadd (!%p1786_p9), %s1454_s14, 4294966784  ;;  %s34_s18 = sadd.s32 1, %s2705_s15   ;;  %s2709_s23 = sld [smem:[#allocation21_spill]] }
 0xac1   : > { %p31_p12 = scmp.ge.s32.totalorder %s34_s18, 4   ;;  %s2710_s15 = sld [smem:[#allocation26_spill]] }
 0xac2   : > { %s2711_s16 = sld [smem:[#allocation22_spill]]  ;;  %s2712_s17 = sld [smem:[#allocation24_spill]] }
 0xac3   : > { %s2713_s29 = smov %s2122_s30  ;;  %33 = sbr.rel (!%p31_p12) target bundleno = 14 (0xe), region = 150 }
 0xac6   : > { %s2714_s30 = smov %s2709_s23 }
 0xaca   :  { %1459 = vsyncpa [#allocation5], 1 }
 0xacb   :  { %1461 = vsyncpa [#allocation5 + $0x1], 1 }
 0xacc   :  { %1462 = vsyncpa [#allocation8], 1 }
 0xacd   :  { %1463 = vsyncpa [#allocation11], 1 }
 0xace   :  { %1464 = vsyncpa [#allocation6], 1 }
 0xacf   :  { %1466 = vsyncpa [#allocation6 + $0x1], 1 }
 0xad0   :  { %1467 = vsyncpa [#allocation14], 1 }
 0xad1   :  { %1469 = vsyncpa [#allocation14 + $0x1], 1 }

</bundles_post_ra>
